<compile_context>
chip_gen: v6e
topology: v6e:2x2x1
jax: 0.10.0
libtpu: 0.0.40
codegen_flags: <defaults>
</compile_context>

<pallas_src>
import math
import functools

import jax
import jax.numpy as jnp
from jax import lax
from jax.experimental import pallas as pl
from jax.experimental.pallas import tpu as pltpu


def neuronal_attention_kernel(x_ref, wqkv_ref, bqkv_ref, wo_ref, bo_ref, mask_ref, o_ref,
                              *, num_heads, head_dim, batch_tile, seq_len):
    Bt, S = batch_tile, seq_len
    H = num_heads * head_dim

    # Fold the batch tile into the matmul M dimension: one lane-dense QKV projection.
    x = x_ref[...].reshape(Bt * S, H).astype(jnp.float32)              # (Bt*S, H)
    qkv = jnp.dot(x, wqkv_ref[...],
                  preferred_element_type=jnp.float32) + bqkv_ref[...]  # (Bt*S, 3H)

    # Pre-scaled temporal mask (nh, S, S): exp(-|i-j|/tau_h) / sqrt(head_dim).
    mask = mask_ref[...]

    # ---- scores for every (batch, head), stacked along sublanes into one slab ----
    score_tiles = []
    for b in range(Bt):                                                # static unroll
        q_b = qkv[b * S:(b + 1) * S, 0:H]                              # (S, H)
        k_b = qkv[b * S:(b + 1) * S, H:2 * H]                          # (S, H)
        kt_b = k_b.T                                                   # one transpose / batch
        for h in range(num_heads):                                     # static unroll
            q_bh = q_b[:, h * head_dim:(h + 1) * head_dim]             # (S, hd)
            kt_bh = kt_b[h * head_dim:(h + 1) * head_dim, :]           # (hd, S)
            s = jnp.dot(q_bh, kt_bh, preferred_element_type=jnp.float32)
            score_tiles.append(s * mask[h])                            # scale folded in mask
    s_slab = jnp.concatenate(score_tiles, axis=0)                      # (Bt*nh*S, S)

    # ---- single batched softmax over the whole slab ----
    m = jnp.max(s_slab, axis=-1, keepdims=True)
    e = jnp.exp(s_slab - m)
    denom = jnp.sum(e, axis=-1, keepdims=True)
    p_slab = e * pl.reciprocal(denom, approx=True)                     # EUP reciprocal
    # dropout(p=0.1) on attention probs: identity in eval/inference mode.
    # TODO(synk): training-mode dropout would need pltpu.prng_seed + prng_random_bits.

    # ---- context + output projection, accumulated per head (no concat) ----
    bo = bo_ref[...]                                                   # (1, H)
    out_tiles = []
    for b in range(Bt):
        v_b = qkv[b * S:(b + 1) * S, 2 * H:3 * H]                      # (S, H)
        out_b = jnp.zeros((S, H), jnp.float32)
        for h in range(num_heads):
            r0 = (b * num_heads + h) * S
            p_bh = p_slab[r0:r0 + S, :]                                # (S, S)
            ctx_bh = jnp.dot(p_bh, v_b[:, h * head_dim:(h + 1) * head_dim],
                             preferred_element_type=jnp.float32)       # (S, hd)
            out_b = out_b + jnp.dot(ctx_bh, wo_ref[h * head_dim:(h + 1) * head_dim, :],
                                    preferred_element_type=jnp.float32)
        out_tiles.append(out_b + bo)
    out_slab = jnp.concatenate(out_tiles, axis=0)                      # (Bt*S, H)
    o_ref[...] = out_slab.reshape(Bt, S, H).astype(o_ref.dtype)        # single store
    # TODO(synk): optional `spikes` / `membrane_potential` modulation + dendritic_gates
    # branches (default None in the PyTorch forward) are not implemented in this kernel.


def neuronal_attention(x, wq, bq, wk, bk, wv, bv, wo, bo, tau, *, num_heads,
                       batch_tile=None):
    """x: (B, S, H). wq/wk/wv/wo: (H, H) = torch weight^T. biases: (1, H). tau: (num_heads,)."""
    B, S, H = x.shape
    head_dim = H // num_heads
    if batch_tile is None:
        batch_tile = B            # fold the whole (tiny) batch into one grid step
    assert B % batch_tile == 0

    # Pack QKV params: one resident weight tile + one bias DMA instead of six inputs.
    wqkv = jnp.concatenate([wq, wk, wv], axis=1)                       # (H, 3H)
    bqkv = jnp.concatenate([bq, bk, bv], axis=1)                       # (1, 3H)

    # Batch-invariant temporal-decay mask with the 1/sqrt(head_dim) scale folded in.
    t = jnp.arange(S, dtype=jnp.float32)
    abs_dt = jnp.abs(t[:, None] - t[None, :])                          # (S, S)
    mask = (jnp.exp(-abs_dt[None] / tau.astype(jnp.float32)[:, None, None])
            * (1.0 / math.sqrt(head_dim)))                             # (nh, S, S), ~2 KiB

    kernel = functools.partial(neuronal_attention_kernel,
                               num_heads=num_heads, head_dim=head_dim,
                               batch_tile=batch_tile, seq_len=S)
    return pl.pallas_call(
        kernel,
        out_shape=jax.ShapeDtypeStruct((B, S, H), x.dtype),
        grid_spec=pltpu.PrefetchScalarGridSpec(
            num_scalar_prefetch=0,
            grid=(B // batch_tile,),                                   # =(1,) at B=2
            in_specs=[
                pl.BlockSpec((batch_tile, S, H), lambda b: (b, 0, 0)),     # x tile
                pl.BlockSpec((H, 3 * H), lambda b: (0, 0)),                # packed QKV weights
                pl.BlockSpec((1, 3 * H), lambda b: (0, 0)),                # packed QKV biases
                pl.BlockSpec((H, H), lambda b: (0, 0)),                    # o_proj weight
                pl.BlockSpec((1, H), lambda b: (0, 0)),                    # o_proj bias
                pl.BlockSpec((num_heads, S, S), lambda b: (0, 0, 0)),      # precomputed mask
            ],
            out_specs=pl.BlockSpec((batch_tile, S, H), lambda b: (b, 0, 0)),
        ),
        compiler_params=pltpu.CompilerParams(
            dimension_semantics=("parallel",)),
    )(x, wqkv, bqkv, wo, bo, mask)


def reference(x, wq, bq, wk, bk, wv, bv, wo, bo, tau, *, num_heads):
    B, S, H = x.shape
    hd = H // num_heads
    hp = lax.Precision.HIGHEST

    def proj(w, b):
        y = jnp.einsum('bsh,hk->bsk', x, w, precision=hp) + b
        return y.reshape(B, S, num_heads, hd).transpose(0, 2, 1, 3)    # (B, nh, S, hd)

    q, k, v = proj(wq, bq), proj(wk, bk), proj(wv, bv)
    scores = jnp.einsum('bhqd,bhkd->bhqk', q, k, precision=hp) / math.sqrt(hd)
    t = jnp.arange(S, dtype=jnp.float32)
    dt = jnp.abs(t[:, None] - t[None, :])
    tmask = jnp.exp(-dt[None, :, :] / tau[:, None, None])              # (nh, S, S)
    scores = scores * tmask[None]
    p = jax.nn.softmax(scores, axis=-1)
    ctx = jnp.einsum('bhqk,bhkd->bhqd', p, v, precision=hp)
    ctx = ctx.transpose(0, 2, 1, 3).reshape(B, S, H)
    return jnp.einsum('bsh,hk->bsk', ctx, wo, precision=hp) + bo


if __name__ == "__main__":
    # Shapes implied by the module: hidden_size=32, num_heads=8 (head_dim=4), batch=2, seq=8
    B, S, H, NH = 2, 8, 32, 8

    key = jax.random.PRNGKey(0)
    keys = jax.random.split(key, 9)
    x = jax.random.normal(keys[0], (B, S, H), dtype=jnp.float32)

    # Deterministic synthetic init (PyTorch Linear-style uniform bounds), weights pre-transposed.
    def lin(kw, kb, fan_in, fan_out):
        bnd = 1.0 / math.sqrt(fan_in)
        w = jax.random.uniform(kw, (fan_in, fan_out), jnp.float32, -bnd, bnd)   # weight^T
        b = jax.random.uniform(kb, (1, fan_out), jnp.float32, -bnd, bnd)
        return w, b

    wq, bq = lin(keys[1], keys[2], H, H)
    wk, bk = lin(keys[3], keys[4], H, H)
    wv, bv = lin(keys[5], keys[6], H, H)
    wo, bo = lin(keys[7], keys[8], H, H)
    tau = jnp.ones((NH,), jnp.float32) * 10.0                          # tau_decay init

    out = neuronal_attention(x, wq, bq, wk, bk, wv, bv, wo, bo, tau, num_heads=NH)
    out = jax.block_until_ready(out)

    ref = reference(x, wq, bq, wk, bk, wv, bv, wo, bo, tau, num_heads=NH)
    assert out.shape == (B, S, H)
    max_err = float(jnp.max(jnp.abs(out - ref)))
    # Tolerance loosened slightly vs 1e-4 because the softmax denominator uses the EUP
    # approximate reciprocal (pl.reciprocal(approx=True)).
    assert jnp.allclose(out, ref, atol=2e-3, rtol=2e-3), max_err

    print("KERNEL_OK")
</pallas_src>

<mosaic_0001>
module attributes {stable_mosaic.version = 11 : i64} {
  func.func @neuronal_attention_kernel(%arg0: i32, %arg1: memref<2x8x32xf32, #tpu.memory_space<vmem>>, %arg2: memref<32x96xf32, #tpu.memory_space<vmem>>, %arg3: memref<1x96xf32, #tpu.memory_space<vmem>>, %arg4: memref<32x32xf32, #tpu.memory_space<vmem>>, %arg5: memref<1x32xf32, #tpu.memory_space<vmem>>, %arg6: memref<8x8x8xf32, #tpu.memory_space<vmem>>, %arg7: memref<2x8x32xf32, #tpu.memory_space<vmem>>) attributes {dimension_semantics = [#tpu.dimension_semantics<parallel>], iteration_bounds = array<i64: 1>, scalar_prefetch = 0 : i64, scratch_operands = 0 : i64, tpu.core_type = #tpu.core_type<tc>, window_params = [{transform_indices = @transform_0, window_bounds = array<i64: 2, 8, 32>}, {pipeline_mode = #tpu.pipeline_mode<synchronous>, transform_indices = @transform_1, window_bounds = array<i64: 32, 96>}, {pipeline_mode = #tpu.pipeline_mode<synchronous>, transform_indices = @transform_2, window_bounds = array<i64: 1, 96>}, {pipeline_mode = #tpu.pipeline_mode<synchronous>, transform_indices = @transform_3, window_bounds = array<i64: 32, 32>}, {pipeline_mode = #tpu.pipeline_mode<synchronous>, transform_indices = @transform_4, window_bounds = array<i64: 1, 32>}, {pipeline_mode = #tpu.pipeline_mode<synchronous>, transform_indices = @transform_5, window_bounds = array<i64: 8, 8, 8>}, {transform_indices = @transform_6, window_bounds = array<i64: 2, 8, 32>}]} {
    %c0 = arith.constant 0 : index
    %c0_0 = arith.constant 0 : index
    %c0_1 = arith.constant 0 : index
    %0 = vector.load %arg1[%c0, %c0_0, %c0_1] : memref<2x8x32xf32, #tpu.memory_space<vmem>>, vector<2x8x32xf32>
    %1 = vector.shape_cast %0 : vector<2x8x32xf32> to vector<16x32xf32>
    %c0_2 = arith.constant 0 : index
    %c0_3 = arith.constant 0 : index
    %2 = vector.load %arg2[%c0_2, %c0_3] : memref<32x96xf32, #tpu.memory_space<vmem>>, vector<32x96xf32>
    %cst = arith.constant dense<0.000000e+00> : vector<16x96xf32>
    %3 = tpu.matmul %1, %2, %cst {dimension_numbers = #tpu.dot_dimension_numbers<[1], [0], [0], [1], [0, 0, 1, 1], [], []>} : vector<16x32xf32>, vector<32x96xf32>, vector<16x96xf32> -> vector<16x96xf32>
    %c0_4 = arith.constant 0 : index
    %c0_5 = arith.constant 0 : index
    %4 = vector.load %arg3[%c0_4, %c0_5] : memref<1x96xf32, #tpu.memory_space<vmem>>, vector<1x96xf32>
    %5 = vector.broadcast %4 : vector<1x96xf32> to vector<16x96xf32>
    %6 = arith.addf %3, %5 : vector<16x96xf32>
    %c0_6 = arith.constant 0 : index
    %c0_7 = arith.constant 0 : index
    %c0_8 = arith.constant 0 : index
    %7 = vector.load %arg6[%c0_6, %c0_7, %c0_8] : memref<8x8x8xf32, #tpu.memory_space<vmem>>, vector<8x8x8xf32>
    %8 = vector.extract_strided_slice %6 {offsets = [0, 0], sizes = [8, 32], strides = [1, 1]} : vector<16x96xf32> to vector<8x32xf32>
    %9 = vector.extract_strided_slice %6 {offsets = [0, 32], sizes = [8, 32], strides = [1, 1]} : vector<16x96xf32> to vector<8x32xf32>
    %10 = tpu.transpose %9, [1, 0] : vector<8x32xf32> -> vector<32x8xf32>
    %11 = vector.extract_strided_slice %8 {offsets = [0, 0], sizes = [8, 4], strides = [1, 1]} : vector<8x32xf32> to vector<8x4xf32>
    %12 = vector.extract_strided_slice %10 {offsets = [0, 0], sizes = [4, 8], strides = [1, 1]} : vector<32x8xf32> to vector<4x8xf32>
    %cst_9 = arith.constant dense<0.000000e+00> : vector<8x8xf32>
    %13 = tpu.matmul %11, %12, %cst_9 {dimension_numbers = #tpu.dot_dimension_numbers<[1], [0], [0], [1], [0, 0, 1, 1], [], []>} : vector<8x4xf32>, vector<4x8xf32>, vector<8x8xf32> -> vector<8x8xf32>
    %14 = vector.extract_strided_slice %7 {offsets = [0, 0, 0], sizes = [1, 8, 8], strides = [1, 1, 1]} : vector<8x8x8xf32> to vector<1x8x8xf32>
    %15 = vector.shape_cast %14 : vector<1x8x8xf32> to vector<8x8xf32>
    %16 = arith.mulf %13, %15 : vector<8x8xf32>
    %17 = vector.extract_strided_slice %8 {offsets = [0, 4], sizes = [8, 4], strides = [1, 1]} : vector<8x32xf32> to vector<8x4xf32>
    %18 = vector.extract_strided_slice %10 {offsets = [4, 0], sizes = [4, 8], strides = [1, 1]} : vector<32x8xf32> to vector<4x8xf32>
    %cst_10 = arith.constant dense<0.000000e+00> : vector<8x8xf32>
    %19 = tpu.matmul %17, %18, %cst_10 {dimension_numbers = #tpu.dot_dimension_numbers<[1], [0], [0], [1], [0, 0, 1, 1], [], []>} : vector<8x4xf32>, vector<4x8xf32>, vector<8x8xf32> -> vector<8x8xf32>
    %20 = vector.extract_strided_slice %7 {offsets = [1, 0, 0], sizes = [1, 8, 8], strides = [1, 1, 1]} : vector<8x8x8xf32> to vector<1x8x8xf32>
    %21 = vector.shape_cast %20 : vector<1x8x8xf32> to vector<8x8xf32>
    %22 = arith.mulf %19, %21 : vector<8x8xf32>
    %23 = vector.extract_strided_slice %8 {offsets = [0, 8], sizes = [8, 4], strides = [1, 1]} : vector<8x32xf32> to vector<8x4xf32>
    %24 = vector.extract_strided_slice %10 {offsets = [8, 0], sizes = [4, 8], strides = [1, 1]} : vector<32x8xf32> to vector<4x8xf32>
    %cst_11 = arith.constant dense<0.000000e+00> : vector<8x8xf32>
    %25 = tpu.matmul %23, %24, %cst_11 {dimension_numbers = #tpu.dot_dimension_numbers<[1], [0], [0], [1], [0, 0, 1, 1], [], []>} : vector<8x4xf32>, vector<4x8xf32>, vector<8x8xf32> -> vector<8x8xf32>
    %26 = vector.extract_strided_slice %7 {offsets = [2, 0, 0], sizes = [1, 8, 8], strides = [1, 1, 1]} : vector<8x8x8xf32> to vector<1x8x8xf32>
    %27 = vector.shape_cast %26 : vector<1x8x8xf32> to vector<8x8xf32>
    %28 = arith.mulf %25, %27 : vector<8x8xf32>
    %29 = vector.extract_strided_slice %8 {offsets = [0, 12], sizes = [8, 4], strides = [1, 1]} : vector<8x32xf32> to vector<8x4xf32>
    %30 = vector.extract_strided_slice %10 {offsets = [12, 0], sizes = [4, 8], strides = [1, 1]} : vector<32x8xf32> to vector<4x8xf32>
    %cst_12 = arith.constant dense<0.000000e+00> : vector<8x8xf32>
    %31 = tpu.matmul %29, %30, %cst_12 {dimension_numbers = #tpu.dot_dimension_numbers<[1], [0], [0], [1], [0, 0, 1, 1], [], []>} : vector<8x4xf32>, vector<4x8xf32>, vector<8x8xf32> -> vector<8x8xf32>
    %32 = vector.extract_strided_slice %7 {offsets = [3, 0, 0], sizes = [1, 8, 8], strides = [1, 1, 1]} : vector<8x8x8xf32> to vector<1x8x8xf32>
    %33 = vector.shape_cast %32 : vector<1x8x8xf32> to vector<8x8xf32>
    %34 = arith.mulf %31, %33 : vector<8x8xf32>
    %35 = vector.extract_strided_slice %8 {offsets = [0, 16], sizes = [8, 4], strides = [1, 1]} : vector<8x32xf32> to vector<8x4xf32>
    %36 = vector.extract_strided_slice %10 {offsets = [16, 0], sizes = [4, 8], strides = [1, 1]} : vector<32x8xf32> to vector<4x8xf32>
    %cst_13 = arith.constant dense<0.000000e+00> : vector<8x8xf32>
    %37 = tpu.matmul %35, %36, %cst_13 {dimension_numbers = #tpu.dot_dimension_numbers<[1], [0], [0], [1], [0, 0, 1, 1], [], []>} : vector<8x4xf32>, vector<4x8xf32>, vector<8x8xf32> -> vector<8x8xf32>
    %38 = vector.extract_strided_slice %7 {offsets = [4, 0, 0], sizes = [1, 8, 8], strides = [1, 1, 1]} : vector<8x8x8xf32> to vector<1x8x8xf32>
    %39 = vector.shape_cast %38 : vector<1x8x8xf32> to vector<8x8xf32>
    %40 = arith.mulf %37, %39 : vector<8x8xf32>
    %41 = vector.extract_strided_slice %8 {offsets = [0, 20], sizes = [8, 4], strides = [1, 1]} : vector<8x32xf32> to vector<8x4xf32>
    %42 = vector.extract_strided_slice %10 {offsets = [20, 0], sizes = [4, 8], strides = [1, 1]} : vector<32x8xf32> to vector<4x8xf32>
    %cst_14 = arith.constant dense<0.000000e+00> : vector<8x8xf32>
    %43 = tpu.matmul %41, %42, %cst_14 {dimension_numbers = #tpu.dot_dimension_numbers<[1], [0], [0], [1], [0, 0, 1, 1], [], []>} : vector<8x4xf32>, vector<4x8xf32>, vector<8x8xf32> -> vector<8x8xf32>
    %44 = vector.extract_strided_slice %7 {offsets = [5, 0, 0], sizes = [1, 8, 8], strides = [1, 1, 1]} : vector<8x8x8xf32> to vector<1x8x8xf32>
    %45 = vector.shape_cast %44 : vector<1x8x8xf32> to vector<8x8xf32>
    %46 = arith.mulf %43, %45 : vector<8x8xf32>
    %47 = vector.extract_strided_slice %8 {offsets = [0, 24], sizes = [8, 4], strides = [1, 1]} : vector<8x32xf32> to vector<8x4xf32>
    %48 = vector.extract_strided_slice %10 {offsets = [24, 0], sizes = [4, 8], strides = [1, 1]} : vector<32x8xf32> to vector<4x8xf32>
    %cst_15 = arith.constant dense<0.000000e+00> : vector<8x8xf32>
    %49 = tpu.matmul %47, %48, %cst_15 {dimension_numbers = #tpu.dot_dimension_numbers<[1], [0], [0], [1], [0, 0, 1, 1], [], []>} : vector<8x4xf32>, vector<4x8xf32>, vector<8x8xf32> -> vector<8x8xf32>
    %50 = vector.extract_strided_slice %7 {offsets = [6, 0, 0], sizes = [1, 8, 8], strides = [1, 1, 1]} : vector<8x8x8xf32> to vector<1x8x8xf32>
    %51 = vector.shape_cast %50 : vector<1x8x8xf32> to vector<8x8xf32>
    %52 = arith.mulf %49, %51 : vector<8x8xf32>
    %53 = vector.extract_strided_slice %8 {offsets = [0, 28], sizes = [8, 4], strides = [1, 1]} : vector<8x32xf32> to vector<8x4xf32>
    %54 = vector.extract_strided_slice %10 {offsets = [28, 0], sizes = [4, 8], strides = [1, 1]} : vector<32x8xf32> to vector<4x8xf32>
    %cst_16 = arith.constant dense<0.000000e+00> : vector<8x8xf32>
    %55 = tpu.matmul %53, %54, %cst_16 {dimension_numbers = #tpu.dot_dimension_numbers<[1], [0], [0], [1], [0, 0, 1, 1], [], []>} : vector<8x4xf32>, vector<4x8xf32>, vector<8x8xf32> -> vector<8x8xf32>
    %56 = vector.extract_strided_slice %7 {offsets = [7, 0, 0], sizes = [1, 8, 8], strides = [1, 1, 1]} : vector<8x8x8xf32> to vector<1x8x8xf32>
    %57 = vector.shape_cast %56 : vector<1x8x8xf32> to vector<8x8xf32>
    %58 = arith.mulf %55, %57 : vector<8x8xf32>
    %59 = vector.extract_strided_slice %6 {offsets = [8, 0], sizes = [8, 32], strides = [1, 1]} : vector<16x96xf32> to vector<8x32xf32>
    %60 = vector.extract_strided_slice %6 {offsets = [8, 32], sizes = [8, 32], strides = [1, 1]} : vector<16x96xf32> to vector<8x32xf32>
    %61 = tpu.transpose %60, [1, 0] : vector<8x32xf32> -> vector<32x8xf32>
    %62 = vector.extract_strided_slice %59 {offsets = [0, 0], sizes = [8, 4], strides = [1, 1]} : vector<8x32xf32> to vector<8x4xf32>
    %63 = vector.extract_strided_slice %61 {offsets = [0, 0], sizes = [4, 8], strides = [1, 1]} : vector<32x8xf32> to vector<4x8xf32>
    %cst_17 = arith.constant dense<0.000000e+00> : vector<8x8xf32>
    %64 = tpu.matmul %62, %63, %cst_17 {dimension_numbers = #tpu.dot_dimension_numbers<[1], [0], [0], [1], [0, 0, 1, 1], [], []>} : vector<8x4xf32>, vector<4x8xf32>, vector<8x8xf32> -> vector<8x8xf32>
    %65 = vector.extract_strided_slice %7 {offsets = [0, 0, 0], sizes = [1, 8, 8], strides = [1, 1, 1]} : vector<8x8x8xf32> to vector<1x8x8xf32>
    %66 = vector.shape_cast %65 : vector<1x8x8xf32> to vector<8x8xf32>
    %67 = arith.mulf %64, %66 : vector<8x8xf32>
    %68 = vector.extract_strided_slice %59 {offsets = [0, 4], sizes = [8, 4], strides = [1, 1]} : vector<8x32xf32> to vector<8x4xf32>
    %69 = vector.extract_strided_slice %61 {offsets = [4, 0], sizes = [4, 8], strides = [1, 1]} : vector<32x8xf32> to vector<4x8xf32>
    %cst_18 = arith.constant dense<0.000000e+00> : vector<8x8xf32>
    %70 = tpu.matmul %68, %69, %cst_18 {dimension_numbers = #tpu.dot_dimension_numbers<[1], [0], [0], [1], [0, 0, 1, 1], [], []>} : vector<8x4xf32>, vector<4x8xf32>, vector<8x8xf32> -> vector<8x8xf32>
    %71 = vector.extract_strided_slice %7 {offsets = [1, 0, 0], sizes = [1, 8, 8], strides = [1, 1, 1]} : vector<8x8x8xf32> to vector<1x8x8xf32>
    %72 = vector.shape_cast %71 : vector<1x8x8xf32> to vector<8x8xf32>
    %73 = arith.mulf %70, %72 : vector<8x8xf32>
    %74 = vector.extract_strided_slice %59 {offsets = [0, 8], sizes = [8, 4], strides = [1, 1]} : vector<8x32xf32> to vector<8x4xf32>
    %75 = vector.extract_strided_slice %61 {offsets = [8, 0], sizes = [4, 8], strides = [1, 1]} : vector<32x8xf32> to vector<4x8xf32>
    %cst_19 = arith.constant dense<0.000000e+00> : vector<8x8xf32>
    %76 = tpu.matmul %74, %75, %cst_19 {dimension_numbers = #tpu.dot_dimension_numbers<[1], [0], [0], [1], [0, 0, 1, 1], [], []>} : vector<8x4xf32>, vector<4x8xf32>, vector<8x8xf32> -> vector<8x8xf32>
    %77 = vector.extract_strided_slice %7 {offsets = [2, 0, 0], sizes = [1, 8, 8], strides = [1, 1, 1]} : vector<8x8x8xf32> to vector<1x8x8xf32>
    %78 = vector.shape_cast %77 : vector<1x8x8xf32> to vector<8x8xf32>
    %79 = arith.mulf %76, %78 : vector<8x8xf32>
    %80 = vector.extract_strided_slice %59 {offsets = [0, 12], sizes = [8, 4], strides = [1, 1]} : vector<8x32xf32> to vector<8x4xf32>
    %81 = vector.extract_strided_slice %61 {offsets = [12, 0], sizes = [4, 8], strides = [1, 1]} : vector<32x8xf32> to vector<4x8xf32>
    %cst_20 = arith.constant dense<0.000000e+00> : vector<8x8xf32>
    %82 = tpu.matmul %80, %81, %cst_20 {dimension_numbers = #tpu.dot_dimension_numbers<[1], [0], [0], [1], [0, 0, 1, 1], [], []>} : vector<8x4xf32>, vector<4x8xf32>, vector<8x8xf32> -> vector<8x8xf32>
    %83 = vector.extract_strided_slice %7 {offsets = [3, 0, 0], sizes = [1, 8, 8], strides = [1, 1, 1]} : vector<8x8x8xf32> to vector<1x8x8xf32>
    %84 = vector.shape_cast %83 : vector<1x8x8xf32> to vector<8x8xf32>
    %85 = arith.mulf %82, %84 : vector<8x8xf32>
    %86 = vector.extract_strided_slice %59 {offsets = [0, 16], sizes = [8, 4], strides = [1, 1]} : vector<8x32xf32> to vector<8x4xf32>
    %87 = vector.extract_strided_slice %61 {offsets = [16, 0], sizes = [4, 8], strides = [1, 1]} : vector<32x8xf32> to vector<4x8xf32>
    %cst_21 = arith.constant dense<0.000000e+00> : vector<8x8xf32>
    %88 = tpu.matmul %86, %87, %cst_21 {dimension_numbers = #tpu.dot_dimension_numbers<[1], [0], [0], [1], [0, 0, 1, 1], [], []>} : vector<8x4xf32>, vector<4x8xf32>, vector<8x8xf32> -> vector<8x8xf32>
    %89 = vector.extract_strided_slice %7 {offsets = [4, 0, 0], sizes = [1, 8, 8], strides = [1, 1, 1]} : vector<8x8x8xf32> to vector<1x8x8xf32>
    %90 = vector.shape_cast %89 : vector<1x8x8xf32> to vector<8x8xf32>
    %91 = arith.mulf %88, %90 : vector<8x8xf32>
    %92 = vector.extract_strided_slice %59 {offsets = [0, 20], sizes = [8, 4], strides = [1, 1]} : vector<8x32xf32> to vector<8x4xf32>
    %93 = vector.extract_strided_slice %61 {offsets = [20, 0], sizes = [4, 8], strides = [1, 1]} : vector<32x8xf32> to vector<4x8xf32>
    %cst_22 = arith.constant dense<0.000000e+00> : vector<8x8xf32>
    %94 = tpu.matmul %92, %93, %cst_22 {dimension_numbers = #tpu.dot_dimension_numbers<[1], [0], [0], [1], [0, 0, 1, 1], [], []>} : vector<8x4xf32>, vector<4x8xf32>, vector<8x8xf32> -> vector<8x8xf32>
    %95 = vector.extract_strided_slice %7 {offsets = [5, 0, 0], sizes = [1, 8, 8], strides = [1, 1, 1]} : vector<8x8x8xf32> to vector<1x8x8xf32>
    %96 = vector.shape_cast %95 : vector<1x8x8xf32> to vector<8x8xf32>
    %97 = arith.mulf %94, %96 : vector<8x8xf32>
    %98 = vector.extract_strided_slice %59 {offsets = [0, 24], sizes = [8, 4], strides = [1, 1]} : vector<8x32xf32> to vector<8x4xf32>
    %99 = vector.extract_strided_slice %61 {offsets = [24, 0], sizes = [4, 8], strides = [1, 1]} : vector<32x8xf32> to vector<4x8xf32>
    %cst_23 = arith.constant dense<0.000000e+00> : vector<8x8xf32>
    %100 = tpu.matmul %98, %99, %cst_23 {dimension_numbers = #tpu.dot_dimension_numbers<[1], [0], [0], [1], [0, 0, 1, 1], [], []>} : vector<8x4xf32>, vector<4x8xf32>, vector<8x8xf32> -> vector<8x8xf32>
    %101 = vector.extract_strided_slice %7 {offsets = [6, 0, 0], sizes = [1, 8, 8], strides = [1, 1, 1]} : vector<8x8x8xf32> to vector<1x8x8xf32>
    %102 = vector.shape_cast %101 : vector<1x8x8xf32> to vector<8x8xf32>
    %103 = arith.mulf %100, %102 : vector<8x8xf32>
    %104 = vector.extract_strided_slice %59 {offsets = [0, 28], sizes = [8, 4], strides = [1, 1]} : vector<8x32xf32> to vector<8x4xf32>
    %105 = vector.extract_strided_slice %61 {offsets = [28, 0], sizes = [4, 8], strides = [1, 1]} : vector<32x8xf32> to vector<4x8xf32>
    %cst_24 = arith.constant dense<0.000000e+00> : vector<8x8xf32>
    %106 = tpu.matmul %104, %105, %cst_24 {dimension_numbers = #tpu.dot_dimension_numbers<[1], [0], [0], [1], [0, 0, 1, 1], [], []>} : vector<8x4xf32>, vector<4x8xf32>, vector<8x8xf32> -> vector<8x8xf32>
    %107 = vector.extract_strided_slice %7 {offsets = [7, 0, 0], sizes = [1, 8, 8], strides = [1, 1, 1]} : vector<8x8x8xf32> to vector<1x8x8xf32>
    %108 = vector.shape_cast %107 : vector<1x8x8xf32> to vector<8x8xf32>
    %109 = arith.mulf %106, %108 : vector<8x8xf32>
    %110 = tpu.concatenate %16, %22, %28, %34, %40, %46, %52, %58, %67, %73, %79, %85, %91, %97, %103, %109 in 0 : vector<8x8xf32>, vector<8x8xf32>, vector<8x8xf32>, vector<8x8xf32>, vector<8x8xf32>, vector<8x8xf32>, vector<8x8xf32>, vector<8x8xf32>, vector<8x8xf32>, vector<8x8xf32>, vector<8x8xf32>, vector<8x8xf32>, vector<8x8xf32>, vector<8x8xf32>, vector<8x8xf32>, vector<8x8xf32> -> vector<128x8xf32>
    %cst_25 = arith.constant dense<0xFF800000> : vector<128xf32>
    %111 = vector.multi_reduction <maximumf>, %110, %cst_25 [1] : vector<128x8xf32> to vector<128xf32>
    %112 = vector.shape_cast %111 : vector<128xf32> to vector<128x1xf32>
    %113 = vector.broadcast %112 : vector<128x1xf32> to vector<128x8xf32>
    %114 = arith.subf %110, %113 : vector<128x8xf32>
    %115 = math.exp %114 : vector<128x8xf32>
    %cst_26 = arith.constant dense<0.000000e+00> : vector<128xf32>
    %116 = vector.multi_reduction <add>, %115, %cst_26 [1] : vector<128x8xf32> to vector<128xf32>
    %117 = vector.shape_cast %116 : vector<128xf32> to vector<128x1xf32>
    %118 = tpu.reciprocal %117 {approx = true} : vector<128x1xf32> -> vector<128x1xf32>
    %119 = vector.broadcast %118 : vector<128x1xf32> to vector<128x8xf32>
    %120 = arith.mulf %115, %119 : vector<128x8xf32>
    %c0_27 = arith.constant 0 : index
    %c0_28 = arith.constant 0 : index
    %121 = vector.load %arg5[%c0_27, %c0_28] : memref<1x32xf32, #tpu.memory_space<vmem>>, vector<1x32xf32>
    %122 = vector.extract_strided_slice %6 {offsets = [0, 64], sizes = [8, 32], strides = [1, 1]} : vector<16x96xf32> to vector<8x32xf32>
    %cst_29 = arith.constant 0.000000e+00 : f32
    %123 = vector.broadcast %cst_29 : f32 to vector<8x32xf32>
    %124 = vector.extract_strided_slice %120 {offsets = [0, 0], sizes = [8, 8], strides = [1, 1]} : vector<128x8xf32> to vector<8x8xf32>
    %125 = vector.extract_strided_slice %122 {offsets = [0, 0], sizes = [8, 4], strides = [1, 1]} : vector<8x32xf32> to vector<8x4xf32>
    %cst_30 = arith.constant dense<0.000000e+00> : vector<8x4xf32>
    %126 = tpu.matmul %124, %125, %cst_30 {dimension_numbers = #tpu.dot_dimension_numbers<[1], [0], [0], [1], [0, 0, 1, 1], [], []>} : vector<8x8xf32>, vector<8x4xf32>, vector<8x4xf32> -> vector<8x4xf32>
    %c0_31 = arith.constant 0 : index
    %c0_32 = arith.constant 0 : index
    %127 = vector.load %arg4[%c0_31, %c0_32] : memref<32x32xf32, #tpu.memory_space<vmem>>, vector<4x32xf32>
    %cst_33 = arith.constant dense<0.000000e+00> : vector<8x32xf32>
    %128 = tpu.matmul %126, %127, %cst_33 {dimension_numbers = #tpu.dot_dimension_numbers<[1], [0], [0], [1], [0, 0, 1, 1], [], []>} : vector<8x4xf32>, vector<4x32xf32>, vector<8x32xf32> -> vector<8x32xf32>
    %129 = arith.addf %123, %128 : vector<8x32xf32>
    %130 = vector.extract_strided_slice %120 {offsets = [8, 0], sizes = [8, 8], strides = [1, 1]} : vector<128x8xf32> to vector<8x8xf32>
    %131 = vector.extract_strided_slice %122 {offsets = [0, 4], sizes = [8, 4], strides = [1, 1]} : vector<8x32xf32> to vector<8x4xf32>
    %cst_34 = arith.constant dense<0.000000e+00> : vector<8x4xf32>
    %132 = tpu.matmul %130, %131, %cst_34 {dimension_numbers = #tpu.dot_dimension_numbers<[1], [0], [0], [1], [0, 0, 1, 1], [], []>} : vector<8x8xf32>, vector<8x4xf32>, vector<8x4xf32> -> vector<8x4xf32>
    %c4 = arith.constant 4 : index
    %c0_35 = arith.constant 0 : index
    %133 = vector.load %arg4[%c4, %c0_35] : memref<32x32xf32, #tpu.memory_space<vmem>>, vector<4x32xf32>
    %cst_36 = arith.constant dense<0.000000e+00> : vector<8x32xf32>
    %134 = tpu.matmul %132, %133, %cst_36 {dimension_numbers = #tpu.dot_dimension_numbers<[1], [0], [0], [1], [0, 0, 1, 1], [], []>} : vector<8x4xf32>, vector<4x32xf32>, vector<8x32xf32> -> vector<8x32xf32>
    %135 = arith.addf %129, %134 : vector<8x32xf32>
    %136 = vector.extract_strided_slice %120 {offsets = [16, 0], sizes = [8, 8], strides = [1, 1]} : vector<128x8xf32> to vector<8x8xf32>
    %137 = vector.extract_strided_slice %122 {offsets = [0, 8], sizes = [8, 4], strides = [1, 1]} : vector<8x32xf32> to vector<8x4xf32>
    %cst_37 = arith.constant dense<0.000000e+00> : vector<8x4xf32>
    %138 = tpu.matmul %136, %137, %cst_37 {dimension_numbers = #tpu.dot_dimension_numbers<[1], [0], [0], [1], [0, 0, 1, 1], [], []>} : vector<8x8xf32>, vector<8x4xf32>, vector<8x4xf32> -> vector<8x4xf32>
    %c8 = arith.constant 8 : index
    %c0_38 = arith.constant 0 : index
    %139 = vector.load %arg4[%c8, %c0_38] : memref<32x32xf32, #tpu.memory_space<vmem>>, vector<4x32xf32>
    %cst_39 = arith.constant dense<0.000000e+00> : vector<8x32xf32>
    %140 = tpu.matmul %138, %139, %cst_39 {dimension_numbers = #tpu.dot_dimension_numbers<[1], [0], [0], [1], [0, 0, 1, 1], [], []>} : vector<8x4xf32>, vector<4x32xf32>, vector<8x32xf32> -> vector<8x32xf32>
    %141 = arith.addf %135, %140 : vector<8x32xf32>
    %142 = vector.extract_strided_slice %120 {offsets = [24, 0], sizes = [8, 8], strides = [1, 1]} : vector<128x8xf32> to vector<8x8xf32>
    %143 = vector.extract_strided_slice %122 {offsets = [0, 12], sizes = [8, 4], strides = [1, 1]} : vector<8x32xf32> to vector<8x4xf32>
    %cst_40 = arith.constant dense<0.000000e+00> : vector<8x4xf32>
    %144 = tpu.matmul %142, %143, %cst_40 {dimension_numbers = #tpu.dot_dimension_numbers<[1], [0], [0], [1], [0, 0, 1, 1], [], []>} : vector<8x8xf32>, vector<8x4xf32>, vector<8x4xf32> -> vector<8x4xf32>
    %c12 = arith.constant 12 : index
    %c0_41 = arith.constant 0 : index
    %145 = vector.load %arg4[%c12, %c0_41] : memref<32x32xf32, #tpu.memory_space<vmem>>, vector<4x32xf32>
    %cst_42 = arith.constant dense<0.000000e+00> : vector<8x32xf32>
    %146 = tpu.matmul %144, %145, %cst_42 {dimension_numbers = #tpu.dot_dimension_numbers<[1], [0], [0], [1], [0, 0, 1, 1], [], []>} : vector<8x4xf32>, vector<4x32xf32>, vector<8x32xf32> -> vector<8x32xf32>
    %147 = arith.addf %141, %146 : vector<8x32xf32>
    %148 = vector.extract_strided_slice %120 {offsets = [32, 0], sizes = [8, 8], strides = [1, 1]} : vector<128x8xf32> to vector<8x8xf32>
    %149 = vector.extract_strided_slice %122 {offsets = [0, 16], sizes = [8, 4], strides = [1, 1]} : vector<8x32xf32> to vector<8x4xf32>
    %cst_43 = arith.constant dense<0.000000e+00> : vector<8x4xf32>
    %150 = tpu.matmul %148, %149, %cst_43 {dimension_numbers = #tpu.dot_dimension_numbers<[1], [0], [0], [1], [0, 0, 1, 1], [], []>} : vector<8x8xf32>, vector<8x4xf32>, vector<8x4xf32> -> vector<8x4xf32>
    %c16 = arith.constant 16 : index
    %c0_44 = arith.constant 0 : index
    %151 = vector.load %arg4[%c16, %c0_44] : memref<32x32xf32, #tpu.memory_space<vmem>>, vector<4x32xf32>
    %cst_45 = arith.constant dense<0.000000e+00> : vector<8x32xf32>
    %152 = tpu.matmul %150, %151, %cst_45 {dimension_numbers = #tpu.dot_dimension_numbers<[1], [0], [0], [1], [0, 0, 1, 1], [], []>} : vector<8x4xf32>, vector<4x32xf32>, vector<8x32xf32> -> vector<8x32xf32>
    %153 = arith.addf %147, %152 : vector<8x32xf32>
    %154 = vector.extract_strided_slice %120 {offsets = [40, 0], sizes = [8, 8], strides = [1, 1]} : vector<128x8xf32> to vector<8x8xf32>
    %155 = vector.extract_strided_slice %122 {offsets = [0, 20], sizes = [8, 4], strides = [1, 1]} : vector<8x32xf32> to vector<8x4xf32>
    %cst_46 = arith.constant dense<0.000000e+00> : vector<8x4xf32>
    %156 = tpu.matmul %154, %155, %cst_46 {dimension_numbers = #tpu.dot_dimension_numbers<[1], [0], [0], [1], [0, 0, 1, 1], [], []>} : vector<8x8xf32>, vector<8x4xf32>, vector<8x4xf32> -> vector<8x4xf32>
    %c20 = arith.constant 20 : index
    %c0_47 = arith.constant 0 : index
    %157 = vector.load %arg4[%c20, %c0_47] : memref<32x32xf32, #tpu.memory_space<vmem>>, vector<4x32xf32>
    %cst_48 = arith.constant dense<0.000000e+00> : vector<8x32xf32>
    %158 = tpu.matmul %156, %157, %cst_48 {dimension_numbers = #tpu.dot_dimension_numbers<[1], [0], [0], [1], [0, 0, 1, 1], [], []>} : vector<8x4xf32>, vector<4x32xf32>, vector<8x32xf32> -> vector<8x32xf32>
    %159 = arith.addf %153, %158 : vector<8x32xf32>
    %160 = vector.extract_strided_slice %120 {offsets = [48, 0], sizes = [8, 8], strides = [1, 1]} : vector<128x8xf32> to vector<8x8xf32>
    %161 = vector.extract_strided_slice %122 {offsets = [0, 24], sizes = [8, 4], strides = [1, 1]} : vector<8x32xf32> to vector<8x4xf32>
    %cst_49 = arith.constant dense<0.000000e+00> : vector<8x4xf32>
    %162 = tpu.matmul %160, %161, %cst_49 {dimension_numbers = #tpu.dot_dimension_numbers<[1], [0], [0], [1], [0, 0, 1, 1], [], []>} : vector<8x8xf32>, vector<8x4xf32>, vector<8x4xf32> -> vector<8x4xf32>
    %c24 = arith.constant 24 : index
    %c0_50 = arith.constant 0 : index
    %163 = vector.load %arg4[%c24, %c0_50] : memref<32x32xf32, #tpu.memory_space<vmem>>, vector<4x32xf32>
    %cst_51 = arith.constant dense<0.000000e+00> : vector<8x32xf32>
    %164 = tpu.matmul %162, %163, %cst_51 {dimension_numbers = #tpu.dot_dimension_numbers<[1], [0], [0], [1], [0, 0, 1, 1], [], []>} : vector<8x4xf32>, vector<4x32xf32>, vector<8x32xf32> -> vector<8x32xf32>
    %165 = arith.addf %159, %164 : vector<8x32xf32>
    %166 = vector.extract_strided_slice %120 {offsets = [56, 0], sizes = [8, 8], strides = [1, 1]} : vector<128x8xf32> to vector<8x8xf32>
    %167 = vector.extract_strided_slice %122 {offsets = [0, 28], sizes = [8, 4], strides = [1, 1]} : vector<8x32xf32> to vector<8x4xf32>
    %cst_52 = arith.constant dense<0.000000e+00> : vector<8x4xf32>
    %168 = tpu.matmul %166, %167, %cst_52 {dimension_numbers = #tpu.dot_dimension_numbers<[1], [0], [0], [1], [0, 0, 1, 1], [], []>} : vector<8x8xf32>, vector<8x4xf32>, vector<8x4xf32> -> vector<8x4xf32>
    %c28 = arith.constant 28 : index
    %c0_53 = arith.constant 0 : index
    %169 = vector.load %arg4[%c28, %c0_53] : memref<32x32xf32, #tpu.memory_space<vmem>>, vector<4x32xf32>
    %cst_54 = arith.constant dense<0.000000e+00> : vector<8x32xf32>
    %170 = tpu.matmul %168, %169, %cst_54 {dimension_numbers = #tpu.dot_dimension_numbers<[1], [0], [0], [1], [0, 0, 1, 1], [], []>} : vector<8x4xf32>, vector<4x32xf32>, vector<8x32xf32> -> vector<8x32xf32>
    %171 = arith.addf %165, %170 : vector<8x32xf32>
    %172 = vector.broadcast %121 : vector<1x32xf32> to vector<8x32xf32>
    %173 = arith.addf %171, %172 : vector<8x32xf32>
    %174 = vector.extract_strided_slice %6 {offsets = [8, 64], sizes = [8, 32], strides = [1, 1]} : vector<16x96xf32> to vector<8x32xf32>
    %cst_55 = arith.constant 0.000000e+00 : f32
    %175 = vector.broadcast %cst_55 : f32 to vector<8x32xf32>
    %176 = vector.extract_strided_slice %120 {offsets = [64, 0], sizes = [8, 8], strides = [1, 1]} : vector<128x8xf32> to vector<8x8xf32>
    %177 = vector.extract_strided_slice %174 {offsets = [0, 0], sizes = [8, 4], strides = [1, 1]} : vector<8x32xf32> to vector<8x4xf32>
    %cst_56 = arith.constant dense<0.000000e+00> : vector<8x4xf32>
    %178 = tpu.matmul %176, %177, %cst_56 {dimension_numbers = #tpu.dot_dimension_numbers<[1], [0], [0], [1], [0, 0, 1, 1], [], []>} : vector<8x8xf32>, vector<8x4xf32>, vector<8x4xf32> -> vector<8x4xf32>
    %c0_57 = arith.constant 0 : index
    %c0_58 = arith.constant 0 : index
    %179 = vector.load %arg4[%c0_57, %c0_58] : memref<32x32xf32, #tpu.memory_space<vmem>>, vector<4x32xf32>
    %cst_59 = arith.constant dense<0.000000e+00> : vector<8x32xf32>
    %180 = tpu.matmul %178, %179, %cst_59 {dimension_numbers = #tpu.dot_dimension_numbers<[1], [0], [0], [1], [0, 0, 1, 1], [], []>} : vector<8x4xf32>, vector<4x32xf32>, vector<8x32xf32> -> vector<8x32xf32>
    %181 = arith.addf %175, %180 : vector<8x32xf32>
    %182 = vector.extract_strided_slice %120 {offsets = [72, 0], sizes = [8, 8], strides = [1, 1]} : vector<128x8xf32> to vector<8x8xf32>
    %183 = vector.extract_strided_slice %174 {offsets = [0, 4], sizes = [8, 4], strides = [1, 1]} : vector<8x32xf32> to vector<8x4xf32>
    %cst_60 = arith.constant dense<0.000000e+00> : vector<8x4xf32>
    %184 = tpu.matmul %182, %183, %cst_60 {dimension_numbers = #tpu.dot_dimension_numbers<[1], [0], [0], [1], [0, 0, 1, 1], [], []>} : vector<8x8xf32>, vector<8x4xf32>, vector<8x4xf32> -> vector<8x4xf32>
    %c4_61 = arith.constant 4 : index
    %c0_62 = arith.constant 0 : index
    %185 = vector.load %arg4[%c4_61, %c0_62] : memref<32x32xf32, #tpu.memory_space<vmem>>, vector<4x32xf32>
    %cst_63 = arith.constant dense<0.000000e+00> : vector<8x32xf32>
    %186 = tpu.matmul %184, %185, %cst_63 {dimension_numbers = #tpu.dot_dimension_numbers<[1], [0], [0], [1], [0, 0, 1, 1], [], []>} : vector<8x4xf32>, vector<4x32xf32>, vector<8x32xf32> -> vector<8x32xf32>
    %187 = arith.addf %181, %186 : vector<8x32xf32>
    %188 = vector.extract_strided_slice %120 {offsets = [80, 0], sizes = [8, 8], strides = [1, 1]} : vector<128x8xf32> to vector<8x8xf32>
    %189 = vector.extract_strided_slice %174 {offsets = [0, 8], sizes = [8, 4], strides = [1, 1]} : vector<8x32xf32> to vector<8x4xf32>
    %cst_64 = arith.constant dense<0.000000e+00> : vector<8x4xf32>
    %190 = tpu.matmul %188, %189, %cst_64 {dimension_numbers = #tpu.dot_dimension_numbers<[1], [0], [0], [1], [0, 0, 1, 1], [], []>} : vector<8x8xf32>, vector<8x4xf32>, vector<8x4xf32> -> vector<8x4xf32>
    %c8_65 = arith.constant 8 : index
    %c0_66 = arith.constant 0 : index
    %191 = vector.load %arg4[%c8_65, %c0_66] : memref<32x32xf32, #tpu.memory_space<vmem>>, vector<4x32xf32>
    %cst_67 = arith.constant dense<0.000000e+00> : vector<8x32xf32>
    %192 = tpu.matmul %190, %191, %cst_67 {dimension_numbers = #tpu.dot_dimension_numbers<[1], [0], [0], [1], [0, 0, 1, 1], [], []>} : vector<8x4xf32>, vector<4x32xf32>, vector<8x32xf32> -> vector<8x32xf32>
    %193 = arith.addf %187, %192 : vector<8x32xf32>
    %194 = vector.extract_strided_slice %120 {offsets = [88, 0], sizes = [8, 8], strides = [1, 1]} : vector<128x8xf32> to vector<8x8xf32>
    %195 = vector.extract_strided_slice %174 {offsets = [0, 12], sizes = [8, 4], strides = [1, 1]} : vector<8x32xf32> to vector<8x4xf32>
    %cst_68 = arith.constant dense<0.000000e+00> : vector<8x4xf32>
    %196 = tpu.matmul %194, %195, %cst_68 {dimension_numbers = #tpu.dot_dimension_numbers<[1], [0], [0], [1], [0, 0, 1, 1], [], []>} : vector<8x8xf32>, vector<8x4xf32>, vector<8x4xf32> -> vector<8x4xf32>
    %c12_69 = arith.constant 12 : index
    %c0_70 = arith.constant 0 : index
    %197 = vector.load %arg4[%c12_69, %c0_70] : memref<32x32xf32, #tpu.memory_space<vmem>>, vector<4x32xf32>
    %cst_71 = arith.constant dense<0.000000e+00> : vector<8x32xf32>
    %198 = tpu.matmul %196, %197, %cst_71 {dimension_numbers = #tpu.dot_dimension_numbers<[1], [0], [0], [1], [0, 0, 1, 1], [], []>} : vector<8x4xf32>, vector<4x32xf32>, vector<8x32xf32> -> vector<8x32xf32>
    %199 = arith.addf %193, %198 : vector<8x32xf32>
    %200 = vector.extract_strided_slice %120 {offsets = [96, 0], sizes = [8, 8], strides = [1, 1]} : vector<128x8xf32> to vector<8x8xf32>
    %201 = vector.extract_strided_slice %174 {offsets = [0, 16], sizes = [8, 4], strides = [1, 1]} : vector<8x32xf32> to vector<8x4xf32>
    %cst_72 = arith.constant dense<0.000000e+00> : vector<8x4xf32>
    %202 = tpu.matmul %200, %201, %cst_72 {dimension_numbers = #tpu.dot_dimension_numbers<[1], [0], [0], [1], [0, 0, 1, 1], [], []>} : vector<8x8xf32>, vector<8x4xf32>, vector<8x4xf32> -> vector<8x4xf32>
    %c16_73 = arith.constant 16 : index
    %c0_74 = arith.constant 0 : index
    %203 = vector.load %arg4[%c16_73, %c0_74] : memref<32x32xf32, #tpu.memory_space<vmem>>, vector<4x32xf32>
    %cst_75 = arith.constant dense<0.000000e+00> : vector<8x32xf32>
    %204 = tpu.matmul %202, %203, %cst_75 {dimension_numbers = #tpu.dot_dimension_numbers<[1], [0], [0], [1], [0, 0, 1, 1], [], []>} : vector<8x4xf32>, vector<4x32xf32>, vector<8x32xf32> -> vector<8x32xf32>
    %205 = arith.addf %199, %204 : vector<8x32xf32>
    %206 = vector.extract_strided_slice %120 {offsets = [104, 0], sizes = [8, 8], strides = [1, 1]} : vector<128x8xf32> to vector<8x8xf32>
    %207 = vector.extract_strided_slice %174 {offsets = [0, 20], sizes = [8, 4], strides = [1, 1]} : vector<8x32xf32> to vector<8x4xf32>
    %cst_76 = arith.constant dense<0.000000e+00> : vector<8x4xf32>
    %208 = tpu.matmul %206, %207, %cst_76 {dimension_numbers = #tpu.dot_dimension_numbers<[1], [0], [0], [1], [0, 0, 1, 1], [], []>} : vector<8x8xf32>, vector<8x4xf32>, vector<8x4xf32> -> vector<8x4xf32>
    %c20_77 = arith.constant 20 : index
    %c0_78 = arith.constant 0 : index
    %209 = vector.load %arg4[%c20_77, %c0_78] : memref<32x32xf32, #tpu.memory_space<vmem>>, vector<4x32xf32>
    %cst_79 = arith.constant dense<0.000000e+00> : vector<8x32xf32>
    %210 = tpu.matmul %208, %209, %cst_79 {dimension_numbers = #tpu.dot_dimension_numbers<[1], [0], [0], [1], [0, 0, 1, 1], [], []>} : vector<8x4xf32>, vector<4x32xf32>, vector<8x32xf32> -> vector<8x32xf32>
    %211 = arith.addf %205, %210 : vector<8x32xf32>
    %212 = vector.extract_strided_slice %120 {offsets = [112, 0], sizes = [8, 8], strides = [1, 1]} : vector<128x8xf32> to vector<8x8xf32>
    %213 = vector.extract_strided_slice %174 {offsets = [0, 24], sizes = [8, 4], strides = [1, 1]} : vector<8x32xf32> to vector<8x4xf32>
    %cst_80 = arith.constant dense<0.000000e+00> : vector<8x4xf32>
    %214 = tpu.matmul %212, %213, %cst_80 {dimension_numbers = #tpu.dot_dimension_numbers<[1], [0], [0], [1], [0, 0, 1, 1], [], []>} : vector<8x8xf32>, vector<8x4xf32>, vector<8x4xf32> -> vector<8x4xf32>
    %c24_81 = arith.constant 24 : index
    %c0_82 = arith.constant 0 : index
    %215 = vector.load %arg4[%c24_81, %c0_82] : memref<32x32xf32, #tpu.memory_space<vmem>>, vector<4x32xf32>
    %cst_83 = arith.constant dense<0.000000e+00> : vector<8x32xf32>
    %216 = tpu.matmul %214, %215, %cst_83 {dimension_numbers = #tpu.dot_dimension_numbers<[1], [0], [0], [1], [0, 0, 1, 1], [], []>} : vector<8x4xf32>, vector<4x32xf32>, vector<8x32xf32> -> vector<8x32xf32>
    %217 = arith.addf %211, %216 : vector<8x32xf32>
    %218 = vector.extract_strided_slice %120 {offsets = [120, 0], sizes = [8, 8], strides = [1, 1]} : vector<128x8xf32> to vector<8x8xf32>
    %219 = vector.extract_strided_slice %174 {offsets = [0, 28], sizes = [8, 4], strides = [1, 1]} : vector<8x32xf32> to vector<8x4xf32>
    %cst_84 = arith.constant dense<0.000000e+00> : vector<8x4xf32>
    %220 = tpu.matmul %218, %219, %cst_84 {dimension_numbers = #tpu.dot_dimension_numbers<[1], [0], [0], [1], [0, 0, 1, 1], [], []>} : vector<8x8xf32>, vector<8x4xf32>, vector<8x4xf32> -> vector<8x4xf32>
    %c28_85 = arith.constant 28 : index
    %c0_86 = arith.constant 0 : index
    %221 = vector.load %arg4[%c28_85, %c0_86] : memref<32x32xf32, #tpu.memory_space<vmem>>, vector<4x32xf32>
    %cst_87 = arith.constant dense<0.000000e+00> : vector<8x32xf32>
    %222 = tpu.matmul %220, %221, %cst_87 {dimension_numbers = #tpu.dot_dimension_numbers<[1], [0], [0], [1], [0, 0, 1, 1], [], []>} : vector<8x4xf32>, vector<4x32xf32>, vector<8x32xf32> -> vector<8x32xf32>
    %223 = arith.addf %217, %222 : vector<8x32xf32>
    %224 = vector.broadcast %121 : vector<1x32xf32> to vector<8x32xf32>
    %225 = arith.addf %223, %224 : vector<8x32xf32>
    %226 = tpu.concatenate %173, %225 in 0 : vector<8x32xf32>, vector<8x32xf32> -> vector<16x32xf32>
    %227 = vector.shape_cast %226 : vector<16x32xf32> to vector<2x8x32xf32>
    %c0_88 = arith.constant 0 : index
    %c0_89 = arith.constant 0 : index
    %c0_90 = arith.constant 0 : index
    %228 = vector.load %arg7[%c0_88, %c0_89, %c0_90] : memref<2x8x32xf32, #tpu.memory_space<vmem>>, vector<2x8x32xf32>
    tpu.vector_store %arg7[%c0_88, %c0_89, %c0_90], %227 {strides = array<i32>} : memref<2x8x32xf32, #tpu.memory_space<vmem>>, vector<2x8x32xf32>,
    return
  }
  func.func @transform_0(%arg0: i32) -> (i32, i32, i32) {
    %c0_i32 = arith.constant 0 : i32
    %c0_i32_0 = arith.constant 0 : i32
    %c0_i32_1 = arith.constant 0 : i32
    return %arg0, %c0_i32, %c0_i32_0 : i32, i32, i32
  }
  func.func @transform_1(%arg0: i32) -> (i32, i32) {
    %c0_i32 = arith.constant 0 : i32
    %c0_i32_0 = arith.constant 0 : i32
    %c0_i32_1 = arith.constant 0 : i32
    return %c0_i32, %c0_i32_0 : i32, i32
  }
  func.func @transform_2(%arg0: i32) -> (i32, i32) {
    %c0_i32 = arith.constant 0 : i32
    %c0_i32_0 = arith.constant 0 : i32
    %c0_i32_1 = arith.constant 0 : i32
    return %c0_i32, %c0_i32_0 : i32, i32
  }
  func.func @transform_3(%arg0: i32) -> (i32, i32) {
    %c0_i32 = arith.constant 0 : i32
    %c0_i32_0 = arith.constant 0 : i32
    %c0_i32_1 = arith.constant 0 : i32
    return %c0_i32, %c0_i32_0 : i32, i32
  }
  func.func @transform_4(%arg0: i32) -> (i32, i32) {
    %c0_i32 = arith.constant 0 : i32
    %c0_i32_0 = arith.constant 0 : i32
    %c0_i32_1 = arith.constant 0 : i32
    return %c0_i32, %c0_i32_0 : i32, i32
  }
  func.func @transform_5(%arg0: i32) -> (i32, i32, i32) {
    %c0_i32 = arith.constant 0 : i32
    %c0_i32_0 = arith.constant 0 : i32
    %c0_i32_1 = arith.constant 0 : i32
    %c0_i32_2 = arith.constant 0 : i32
    return %c0_i32, %c0_i32_0, %c0_i32_1 : i32, i32, i32
  }
  func.func @transform_6(%arg0: i32) -> (i32, i32, i32) {
    %c0_i32 = arith.constant 0 : i32
    %c0_i32_0 = arith.constant 0 : i32
    %c0_i32_1 = arith.constant 0 : i32
    return %arg0, %c0_i32, %c0_i32_0 : i32, i32, i32
  }
}

</mosaic_0001>

<bundles_post_ra>
// kernel: tpu_custom_call.1
= control target key start
LH: loop header
LB: loop body
LE: loop exit
PB: predicated region body
PF: predicated region fallthrough
CT: control target
= control target key end

     0   :  { %11 = vsyncpa [#allocation3], 0  ;;  %s5369_s0 = inlined_call_operand.hbm [shape: f32[2,8,32], index: 0, kind: input, shape index: {}]   ;;  %s5370_s1 = inlined_call_operand.hbm [shape: f32[32,96], index: 1, kind: input, shape index: {}]   ;;  %s5371_s2 = inlined_call_operand.vmem [shape: f32[1,96], index: 2, kind: input, shape index: {}]   ;;  %s5372_s3 = inlined_call_operand.hbm [shape: f32[32,32], index: 3, kind: input, shape index: {}]   ;;  %s5373_s4 = inlined_call_operand.vmem [shape: f32[1,32], index: 4, kind: input, shape index: {}]   ;;  %s5374_s5 = inlined_call_operand.hbm [shape: f32[8,8,8], index: 5, kind: input, shape index: {}]   ;;  %s5375_s6 = inlined_call_operand.hbm [shape: f32[2,8,32], index: 6, kind: output, shape index: {}]  }
   0x1   :  { %12 = vsyncpa [#allocation6], 0 }
   0x2   :  { %13 = vsyncpa [#allocation9], 0 }
   0x3   :  { %14 = vsyncpa [#allocation4], 0  ;;  %s4722_s21 = smov [#allocation5]   ;;  %s4723_s23 = smov [#allocation2]  }
   0x4   :  { %s32_s22 = sshll.u32 %s4722_s21, 4  ;;  %s20_s24 = sshll.u32 %s4723_s23, 4  ;;  %s33_s22 = int_to_ptr.vmem [resolvable:$true] %s32_s22  ;;  %s21_s24 = int_to_ptr.vmem [resolvable:$true] %s20_s24 }
   0x5   :  { %s4622_s25 = scalar_lea.vmem %s33_s22, 512  ;;  %p4627_p1 = scmp.lt.s32.totalorder %s33_s22, %s33_s22 }
   0x6   :  { %p4623_p0 = scmp.ne.s32.totalorder %s33_s22, %s4622_s25  ;;  %p4628_p2 = scmp.lt.s32.totalorder %s4622_s25, %s4622_s25 }
   0x8   :  { %p4629_p3 = por %p4628_p2, %p4627_p1 }
   0xa   :  { %p4630_p4 = pnand %p4629_p3, %p4623_p0 }
   0xc   :  { %4633 = shalt.err (!%p4630_p4)
}
   0xd   :  { %s4724_s26 = smov 128   ;;  %s4725_s27 = smov 8  }
   0xe   :  { %38 = dma.hbm_to_vmem [thread:$0]  %s5370_s1, 512, %s33_s22, [#allocation6], %s4724_s26, %s4724_s26, %s4725_s27  }
   0xf   :  { %s4642_s30 = scalar_lea.vmem %s21_s24, 256  ;;  %p4647_p6 = scmp.lt.s32.totalorder %s21_s24, %s21_s24 }
  0x10   :  { %p4643_p5 = scmp.ne.s32.totalorder %s21_s24, %s4642_s30  ;;  %p4648_p7 = scmp.lt.s32.totalorder %s4642_s30, %s4642_s30 }
  0x12   :  { %p4649_p8 = por %p4648_p7, %p4647_p6 }
  0x14   :  { %p4650_p9 = pnand %p4649_p8, %p4643_p5 }
  0x16   :  { %4653 = shalt.err (!%p4650_p9)
}
  0x17   :  { %26 = dma.hbm_to_vmem [thread:$0]  %s5369_s0, 256, %s21_s24, [#allocation3], %s4724_s26, %s4724_s26, %s4725_s27  }
  0x18   :  { %s4726_s9 = smov [#allocation7]   ;;  %s4727_s11 = smov [#allocation8]  }
  0x19   :  { %s46_s10 = sshll.u32 %s4726_s9, 4  ;;  %s60_s12 = sshll.u32 %s4727_s11, 4  ;;  %s47_s10 = int_to_ptr.vmem [resolvable:$true] %s46_s10  ;;  %s61_s12 = int_to_ptr.vmem [resolvable:$true] %s60_s12 }
  0x1a   :  { %s4662_s1 = scalar_lea.vmem %s47_s10, 512  ;;  %p4667_p11 = scmp.lt.s32.totalorder %s47_s10, %s47_s10 }
  0x1b   :  { %p4663_p10 = scmp.ne.s32.totalorder %s47_s10, %s4662_s1  ;;  %p4668_p12 = scmp.lt.s32.totalorder %s4662_s1, %s4662_s1 }
  0x1d   :  { %p4669_p13 = por %p4668_p12, %p4667_p11 }
  0x1f   :  { %p4670_p0 = pnand %p4669_p13, %p4663_p10 }
  0x21   :  { %4673 = shalt.err (!%p4670_p0)
}
  0x22   :  { %52 = dma.hbm_to_vmem [thread:$0]  %s5372_s3, 512, %s47_s10, [#allocation6], %s4724_s26, %s4724_s26, %s4725_s27  }
  0x23   :  { %s4682_s0 = scalar_lea.vmem %s61_s12, 1024  ;;  %p4687_p2 = scmp.lt.s32.totalorder %s61_s12, %s61_s12 }
  0x24   :  { %p4683_p1 = scmp.ne.s32.totalorder %s61_s12, %s4682_s0  ;;  %p4688_p3 = scmp.lt.s32.totalorder %s4682_s0, %s4682_s0 }
  0x26   :  { %p4689_p4 = por %p4688_p3, %p4687_p2 }
  0x28   :  { %p4690_p5 = pnand %p4689_p4, %p4683_p1 }
  0x2a   :  { %4693 = shalt.err (!%p4690_p5)
}
  0x2b   :  { %66 = dma.hbm_to_vmem [thread:$0]  %s5374_s5, 1024, %s61_s12, [#allocation9], %s4724_s26, %s4724_s26, %s4725_s27  }
  0x2c   :  { %4714 = dma.done.wait [#allocation3], 256  }
  0x2d   :  { %4715 = vsyncadd [#allocation3], 4294967040 }
  0x2e   :  { %4716 = dma.done.wait [#allocation6], 1024  }
  0x2f   :  { %4717 = vsyncadd [#allocation6], 4294966272 }
  0x30   :  { %4718 = dma.done.wait [#allocation9], 1024  }
  0x31   :  { %4719 = vsyncadd [#allocation9], 4294966272  ;;  %vm92_vm0 = vcmask 261120   ;;  %v84_v0 = vld [vmem:[#allocation5 + $0x18] sm:$0xff]  ;;  %v83_v1 = vld [vmem:[#allocation5 + $0x10] sm:$0xff]  ;;  %v4728_v6 = vmov 0.0  }
  0x32   :  { %4267 = vmatprep.subr.mxu0 %v84_v0  ;;  %v79_v2 = vld [vmem:[#allocation2] sm:$0xff]  ;;  %v82_v3 = vld [vmem:[#allocation5 + $0x8] sm:$0xff]  ;;  %v81_v4 = vld [vmem:[#allocation5] sm:$0xff]  ;;  %4278 = vmatprep.subr.mxu1 %v4728_v6  ;;  %vm4729_vm1 = vmmov 0   ;;  %s4730_s17 = smov 124   ;;  %s4731_s18 = smov 96  }
  0x33   :  { %4268 = vmatpush3.msra.mxu0 %v84_v0  ;;  %4275 = vmatprep.mubr.msk.f32.mxu0 %vm92_vm0, %v79_v2  ;;  %v80_v5 = vld [vmem:[#allocation2 + $0x8] sm:$0xff]  ;;  %v4081_v8 = vld [vmem:[%s5371_s2] ss:$0 sm:$0xff]  ;;  %s4732_s19 = smov 88   ;;  %s4733_s20 = smov 92   ;;  %vm185_vm2 = vcmask 31744  }
  0x34   :  { %4269 = vmatprep.subr.mxu0 %v83_v1  ;;  %4280 = vmatprep.mubr.msk.f32.mxu1 %vm4729_vm1, %v4728_v6  ;;  %s4734_s21 = smov 84   ;;  %s4735_s2 = smov 120   ;;  %v4903_v30 = vld [vmem:[#allocation8 + $0x8] sm:$0xff]  ;;  %vm1445_vm3 = vcmask 64512   ;;  %v4921_v47 = vld [vmem:[#allocation8 + $0x10] sm:$0xff]  ;;  %v4930_v52 = vld [vmem:[#allocation8 + $0x38] sm:$0xff] }
  0x35   :  { %4270 = vmatpush3.msra.mxu0 %v83_v1  ;;  %s4736_s22 = smov 80   ;;  %s4737_s23 = smov 116   ;;  %v4924_v49 = vld [vmem:[#allocation8 + $0x28] sm:$0xff]  ;;  %vm1780_vm4 = vcmask 1043456  }
  0x36   :  { %4271 = vmatprep.subr.mxu0 %v82_v3  ;;  %s4738_s24 = smov 76   ;;  %s4739_s25 = smov 112  }
  0x37   :  { %4272 = vmatpush3.msra.mxu0 %v82_v3  ;;  %s4740_s28 = smov 72   ;;  %s4741_s29 = smov 108   ;;  %v4957_v3 = vld [vmem:[#allocation8] sm:$0xff] }
  0x38   :  { %4273 = vmatprep.subr.mxu0 %v81_v4  ;;  %s4742_s30 = smov 68   ;;  %s4743_s7 = smov 104  }
  0x39   :  { %4274 = vmatpush3.msra.mxu0 %v81_v4  ;;  %s4744_s8 = smov 100   ;;  %s4745_s9 = smov 60  }
  0x3a   :  { %4276 = vmatmul.mubr.msk.f32.vlgmr.msra.gmra.mxu0 %vm92_vm0, %v80_v5  ;;  %4288 = vmatprep.subr.mxu0 %v4728_v6  ;;  %s4746_s10 = smov 56   ;;  %s4747_s11 = smov 48  }
  0x3b   :  { %4290 = vmatprep.mubr.msk.f32.mxu0 %vm4729_vm1, %v4728_v6  ;;  %s4748_s12 = smov 44   ;;  %s4749_s1 = smov 40  }
  0x3c   :  { %s4750_s13 = smov 64   ;;  %s4751_s14 = smov 36  }
  0x3d   :  { %s4752_s0 = smov 52  }
  0xfa   :  { %v4277_v7 = vpop.f32.mrf.mxu0 }
  0xfb   :  { %v4853_v11 = vadd.f32 %v4277_v7, %v4081_v8  ;;  %v4961_v7 = vld [vmem:[#allocation8 + $0x18] sm:$0xff] }
  0xfc   :  { %v165_v9 = vpop.f32.mrf.mxu0 }
  0xfd   :  { %v4824_v10 = vadd.f32 %v4081_v8, %v165_v9 }
  0xff   :  { %261 = vrot.lane.b32.xlu1 %v4824_v10, %s4730_s17  ;;  %183 = vrot.lane.b32.xlu0 %v4824_v10, %s4731_s18 }
 0x103   :  { %342 = vrot.lane.b32.xlu1 %v4824_v10, %s4732_s19  ;;  %263 = vrot.lane.b32.xlu0 %v4824_v10, %s4733_s20 }
 0x107   :  { %421 = vrot.lane.b32.xlu1 %v4824_v10, %s4734_s21  ;;  %340 = vrot.lane.b32.xlu0 %v4824_v10, %s4735_s2 }
 0x10b   :  { %500 = vrot.lane.b32.xlu1 %v4824_v10, %s4736_s22  ;;  %419 = vrot.lane.b32.xlu0 %v4824_v10, %s4737_s23 }
 0x10f   :  { %579 = vrot.lane.b32.xlu1 %v4824_v10, %s4738_s24  ;;  %498 = vrot.lane.b32.xlu0 %v4824_v10, %s4739_s25 }
 0x113   :  { %658 = vrot.lane.b32.xlu1 %v4824_v10, %s4740_s28  ;;  %577 = vrot.lane.b32.xlu0 %v4824_v10, %s4741_s29 }
 0x117   :  { %737 = vrot.lane.b32.xlu1 %v4824_v10, %s4742_s30  ;;  %656 = vrot.lane.b32.xlu0 %v4824_v10, %s4743_s7 }
 0x11b   :  { %735 = vrot.lane.b32.xlu0 %v4824_v10, %s4744_s8 }
 0x11f   :  { %894 = vrot.lane.b32.xlu0 %v4853_v11, %s4733_s20 }
 0x123   :  { %1050 = vrot.lane.b32.xlu0 %v4853_v11, %s4737_s23 }
 0x127   :  { %1208 = vrot.lane.b32.xlu0 %v4853_v11, %s4741_s29 }
 0x171   :  { %v262_v12 = vpop.permute.xlu1 %261  ;;  %v184_v13 = vpop.permute.xlu0 %183 }
 0x172   :  { %4279 = vmatpush3.xpose.msk.msra.mxu1 %vm185_vm2, %v184_v13 }
 0x173   :  { %4283 = vmatprep.subr.mxu1 %v4728_v6 }
 0x175   :  { %v343_v14 = vpop.permute.xlu1 %342  ;;  %4281 = vmatmul.mubr.msk.f32.vlgmr.msra.gmra.mxu1 %vm185_vm2, %v4824_v10  ;;  %v264_v15 = vpop.permute.xlu0 %263 }
 0x176   :  { %4284 = vmatpush3.xpose.msk.msra.mxu1 %vm185_vm2, %v264_v15  ;;  %4289 = vmatpush3.xpose.msk.msra.mxu0 %vm185_vm2, %v343_v14  ;;  %v4965_v15 = vld [vmem:[#allocation8 + $0x20] sm:$0xff] }
 0x177   :  { %4285 = vmatprep.mubr.msk.f32.mxu1 %vm4729_vm1, %v4728_v6  ;;  %4293 = vmatprep.subr.mxu1 %v4728_v6 }
 0x178   :  { %4298 = vmatprep.subr.mxu0 %v4728_v6 }
 0x179   :  { %v422_v16 = vpop.permute.xlu1 %421  ;;  %4286 = vmatmul.mubr.msk.f32.vlgmr.msra.gmra.mxu1 %vm185_vm2, %v262_v12  ;;  %v341_v17 = vpop.permute.xlu0 %340 }
 0x17a   :  { %4291 = vmatmul.mubr.msk.f32.vlgmr.msra.gmra.mxu0 %vm185_vm2, %v341_v17  ;;  %4294 = vmatpush3.xpose.msk.msra.mxu1 %vm185_vm2, %v422_v16 }
 0x17b   :  { %4295 = vmatprep.mubr.msk.f32.mxu1 %vm4729_vm1, %v4728_v6  ;;  %4300 = vmatprep.mubr.msk.f32.mxu0 %vm4729_vm1, %v4728_v6 }
 0x17c   :  { %4303 = vmatprep.subr.mxu1 %v4728_v6 }
 0x17d   :  { %v501_v18 = vpop.permute.xlu1 %500  ;;  %v420_v19 = vpop.permute.xlu0 %419 }
 0x17e   :  { %4296 = vmatmul.mubr.msk.f32.vlgmr.msra.gmra.mxu1 %vm185_vm2, %v420_v19  ;;  %4299 = vmatpush3.xpose.msk.msra.mxu0 %vm185_vm2, %v501_v18  ;;  %v4970_v18 = vld [vmem:[#allocation8 + $0x30] sm:$0xff] }
 0x17f   :  { %4305 = vmatprep.mubr.msk.f32.mxu1 %vm4729_vm1, %v4728_v6  ;;  %4308 = vmatprep.subr.mxu0 %v4728_v6 }
 0x181   :  { %v580_v20 = vpop.permute.xlu1 %579  ;;  %v499_v21 = vpop.permute.xlu0 %498 }
 0x182   :  { %4301 = vmatmul.mubr.msk.f32.vlgmr.msra.gmra.mxu0 %vm185_vm2, %v499_v21  ;;  %4304 = vmatpush3.xpose.msk.msra.mxu1 %vm185_vm2, %v580_v20 }
 0x183   :  { %4310 = vmatprep.mubr.msk.f32.mxu0 %vm4729_vm1, %v4728_v6  ;;  %4313 = vmatprep.subr.mxu1 %v4728_v6 }
 0x185   :  { %v659_v22 = vpop.permute.xlu1 %658  ;;  %v578_v23 = vpop.permute.xlu0 %577 }
 0x186   :  { %4306 = vmatmul.mubr.msk.f32.vlgmr.msra.gmra.mxu1 %vm185_vm2, %v578_v23  ;;  %4309 = vmatpush3.xpose.msk.msra.mxu0 %vm185_vm2, %v659_v22 }
 0x187   :  { %4315 = vmatprep.mubr.msk.f32.mxu1 %vm4729_vm1, %v4728_v6  ;;  %4318 = vmatprep.subr.mxu0 %v4728_v6 }
 0x189   :  { %v738_v24 = vpop.permute.xlu1 %737  ;;  %v657_v25 = vpop.permute.xlu0 %656 }
 0x18a   :  { %4311 = vmatmul.mubr.msk.f32.vlgmr.msra.gmra.mxu0 %vm185_vm2, %v657_v25  ;;  %4314 = vmatpush3.xpose.msk.msra.mxu1 %vm185_vm2, %v738_v24 }
 0x18b   :  { %4323 = vmatprep.subr.mxu1 %v4728_v6  ;;  %4320 = vmatprep.mubr.msk.f32.mxu0 %vm4729_vm1, %v4728_v6 }
 0x18d   :  { %v736_v26 = vpop.permute.xlu0 %735 }
 0x18e   :  { %4316 = vmatmul.mubr.msk.f32.vlgmr.msra.gmra.mxu1 %vm185_vm2, %v736_v26 }
 0x18f   :  { %4325 = vmatprep.mubr.msk.f32.mxu1 %vm4729_vm1, %v4728_v6 }
 0x191   :  { %v895_v27 = vpop.permute.xlu0 %894 }
 0x192   :  { %4324 = vmatpush3.xpose.msk.msra.mxu1 %vm185_vm2, %v895_v27 }
 0x193   :  { %4333 = vmatprep.subr.mxu1 %v4728_v6 }
 0x195   :  { %v1051_v61 = vpop.permute.xlu0 %1050 }
 0x199   :  { %v1209_v63 = vpop.permute.xlu0 %1208 }
 0x235   :  { %v4901_v28 = vpop.f32.mrf.mxu1 }
 0x236   :  { %v260_v5 = vmul.f32 %v4901_v28, %v4957_v3 }
 0x237   :  { %v4282_v29 = vpop.f32.mrf.mxu1 }
 0x238   :  { %v1446_v14 = vsel %vm1445_vm3, %v260_v5, -inf }
 0x239   :  { %v335_v31 = vpop.f32.mrf.mxu1 }
 0x23a   :  { %v339_v32 = vmul.f32 %v335_v31, %v4903_v30  ;;  %v414_v33 = vpop.f32.mrf.mxu0 }
 0x23b   :  { %v4287_v34 = vpop.f32.mrf.mxu1  ;;  %v418_v48 = vmul.f32 %v414_v33, %v4921_v47 }
 0x23c   :  { %v4292_v35 = vpop.f32.mrf.mxu0  ;;  %v1449_v36 = vsel %vm1445_vm3, %v339_v32, -inf }
 0x23d   :  { %1450 = vmax.xlane.f32.xlu1 %v1449_v36  ;;  %v1452_v51 = vsel %vm1445_vm3, %v418_v48, -inf }
 0x23e   :  { %v493_v37 = vpop.f32.mrf.mxu1 }
 0x23f   :  { %v497_v12 = vmul.f32 %v493_v37, %v4961_v7 }
 0x240   :  { %v4297_v38 = vpop.f32.mrf.mxu1 }
 0x241   :  { %v1455_v17 = vsel %vm1445_vm3, %v497_v12, -inf }
 0x242   :  { %v4907_v39 = vpop.f32.mrf.mxu0 }
 0x243   :  { %v576_v16 = vmul.f32 %v4907_v39, %v4965_v15 }
 0x244   :  { %v4302_v40 = vpop.f32.mrf.mxu0 }
 0x245   :  { %v1458_v20 = vsel %vm1445_vm3, %v576_v16, -inf }
 0x246   :  { %v651_v41 = vpop.f32.mrf.mxu1 }
 0x247   :  { %v4927_v50 = vmul.f32 %v651_v41, %v4924_v49 }
 0x248   :  { %v4307_v42 = vpop.f32.mrf.mxu1 }
 0x249   :  { %v1461_v54 = vsel %vm1445_vm3, %v4927_v50, -inf }
 0x24a   :  { %v4909_v43 = vpop.f32.mrf.mxu0 }
 0x24b   :  { %v734_v19 = vmul.f32 %v4909_v43, %v4970_v18 }
 0x24c   :  { %v4312_v44 = vpop.f32.mrf.mxu0 }
 0x24d   :  { %v1464_v21 = vsel %vm1445_vm3, %v734_v19, -inf }
 0x24e   :  { %892 = vrot.lane.b32.xlu1 %v4853_v11, %s4730_s17  ;;  %v809_v45 = vpop.f32.mrf.mxu1 }
 0x24f   :  { %v4933_v53 = vmul.f32 %v809_v45, %v4930_v52 }
 0x250   :  { %v4317_v46 = vpop.f32.mrf.mxu1 }
 0x251   :  { %v1467_v55 = vsel %vm1445_vm3, %v4933_v53, -inf }
 0x252   :  { %1052 = vrot.lane.b32.xlu1 %v4853_v11, %s4734_s21 }
 0x256   :  { %1210 = vrot.lane.b32.xlu1 %v4853_v11, %s4738_s24 }
 0x25a   :  { %1368 = vrot.lane.b32.xlu1 %v4853_v11, %s4742_s30 }
 0x25e   :  { %1700 = vrot.lane.b32.xlu1 %v4824_v10, %s4745_s9 }
 0x282   :  { %1453 = vmax.xlane.f32.xlu1 %v1452_v51 }
 0x286   :  { %1462 = vmax.xlane.f32.xlu1 %v1461_v54 }
 0x28a   :  { %1468 = vmax.xlane.f32.xlu1 %v1467_v55 }
 0x2c6   :  { %v1451_v56 = vpop.xlane.xlu1 %1450 }
 0x2c7   :  { %v1495_v57 = vsub.f32 %v339_v32, %v1451_v56 }
 0x2c9   :  { %v1512_v58 = vmul.f32 1.442695, %v1495_v57 }
 0x2ca   :  { %v893_v59 = vpop.permute.xlu1 %892 }
 0x2cb   :  { %4550 = vpow2.f32 %v1512_v58  ;;  %4326 = vmatmul.mubr.msk.f32.vlgmr.msra.gmra.mxu1 %vm185_vm2, %v893_v59 }
 0x2cc   :  { %4335 = vmatprep.mubr.msk.f32.mxu1 %vm4729_vm1, %v4728_v6 }
 0x2ce   :  { %v1053_v60 = vpop.permute.xlu1 %1052 }
 0x2cf   :  { %4334 = vmatpush3.xpose.msk.msra.mxu1 %vm185_vm2, %v1053_v60 }
 0x2d0   :  { %4343 = vmatprep.subr.mxu1 %v4728_v6 }
 0x2d2   :  { %v1211_v62 = vpop.permute.xlu1 %1210  ;;  %4336 = vmatmul.mubr.msk.f32.vlgmr.msra.gmra.mxu1 %vm185_vm2, %v1051_v61 }
 0x2d3   :  { %4344 = vmatpush3.xpose.msk.msra.mxu1 %vm185_vm2, %v1211_v62  ;;  %4345 = vmatprep.mubr.msk.f32.mxu1 %vm4729_vm1, %v4728_v6 }
 0x2d4   :  { %4353 = vmatprep.subr.mxu1 %v4728_v6 }
 0x2d6   :  { %v1369_v0 = vpop.permute.xlu1 %1368  ;;  %4346 = vmatmul.mubr.msk.f32.vlgmr.msra.gmra.mxu1 %vm185_vm2, %v1209_v63 }
 0x2d7   :  { %4354 = vmatpush3.xpose.msk.msra.mxu1 %vm185_vm2, %v1369_v0  ;;  %4355 = vmatprep.mubr.msk.f32.mxu1 %vm4729_vm1, %v4728_v6 }
 0x2d8   :  { %v4551_v1 = vpop.eup %4550  ;;  %4363 = vmatprep.subr.mxu1 %v4728_v6 }
 0x2d9   :  { %v1545_v2 = vsel %vm1445_vm3, %v4551_v1, 0.0 }
 0x2da   :  { %1546 = vadd.xlane.f32.xlu0 %v1545_v2  ;;  %v1701_v4 = vpop.permute.xlu1 %1700 }
 0x2f0   :  { %1366 = vrot.lane.b32.xlu0 %v4853_v11, %s4744_s8 }
 0x30b   :  { %v1454_v8 = vpop.xlane.xlu1 %1453 }
 0x30c   :  { %v1496_v9 = vsub.f32 %v418_v48, %v1454_v8 }
 0x30e   :  { %v1514_v13 = vmul.f32 1.442695, %v1496_v9 }
 0x30f   :  { %1447 = vmax.xlane.f32.xlu0 %v1446_v14  ;;  %v1463_v60 = vpop.xlane.xlu1 %1462 }
 0x310   :  { %4552 = vpow2.f32 %v1514_v13  ;;  %v1499_v61 = vsub.f32 %v4927_v50, %v1463_v60 }
 0x312   :  { %v1520_v63 = vmul.f32 1.442695, %v1499_v61 }
 0x313   :  { %1456 = vmax.xlane.f32.xlu0 %v1455_v17  ;;  %v1469_v62 = vpop.xlane.xlu1 %1468 }
 0x314   :  { %v1501_v0 = vsub.f32 %v4933_v53, %v1469_v62 }
 0x317   :  { %1459 = vmax.xlane.f32.xlu0 %v1458_v20 }
 0x31b   :  { %1465 = vmax.xlane.f32.xlu0 %v1464_v21 }
 0x31d   :  { %v4976_v22 = vpop.eup %4552 }
 0x31e   :  { %v1548_v23 = vsel %vm1445_vm3, %v4976_v22, 0.0 }
 0x31f   :  { %1549 = vadd.xlane.f32.xlu1 %v1548_v23 }
 0x330   :  { %973 = vrot.lane.b32.xlu1 %v4853_v11, %s4732_s19 }
 0x334   :  { %1289 = vrot.lane.b32.xlu1 %v4853_v11, %s4740_s28 }
 0x338   :  { %1930 = vrot.lane.b32.xlu1 %v4824_v10, %s4746_s10 }
 0x363   :  { %v1547_v24 = vpop.xlane.xlu0 %1546 }
 0x364   :  { %4554 = vrcp.f32 %v1547_v24 }
 0x367   :  { %v1367_v25 = vpop.permute.xlu0 %1366 }
 0x368   :  { %4356 = vmatmul.mubr.msk.f32.vlgmr.msra.gmra.mxu1 %vm185_vm2, %v1367_v25 }
 0x369   :  { %4364 = vmatpush3.msra.mxu1 %v1701_v4  ;;  %4365 = vmatprep.mubr.msk.f32.mxu1 %vm4729_vm1, %v4728_v6 }
 0x36a   :  { %4373 = vmatprep.subr.mxu1 %v4728_v6 }
 0x371   :  { %v4555_v26 = vpop.eup %4554 }
 0x372   :  { %v1607_v27 = vmul.f32 %v4555_v26, %v4551_v1  ;;  %v1524_v1 = vmul.f32 1.442695, %v1501_v0 }
 0x374   :  { %4366 = vmatmul.mubr.msk.f32.vlgmr.msra.gmra.mxu1 %vm1445_vm3, %v1607_v27 }
 0x375   :  { %4375 = vmatprep.mubr.msk.f32.mxu1 %vm4729_vm1, %v4728_v6 }
 0x38b   :  { %v4993_v28 = vpop.f32.mrf.mxu1 }
 0x38c   :  { %v5051_v53 = vmul.f32 %v4993_v28, %v4903_v30  ;;  %v5079_v28 = vld [vmem:[#allocation7 + $0x4] sm:$0xf] }
 0x38d   :  { %v4327_v29 = vpop.f32.mrf.mxu1 }
 0x392   :  { %v4995_v31 = vpop.f32.mrf.mxu1 }
 0x394   :  { %v4337_v32 = vpop.f32.mrf.mxu1 }
 0x396   :  { %v4997_v33 = vpop.f32.mrf.mxu1 }
 0x398   :  { %v4347_v34 = vpop.f32.mrf.mxu1  ;;  %v1448_v35 = vpop.xlane.xlu0 %1447 }
 0x399   :  { %v1494_v36 = vsub.f32 %v260_v5, %v1448_v35 }
 0x39b   :  { %v1510_v37 = vmul.f32 1.442695, %v1494_v36 }
 0x39c   :  { %v1457_v38 = vpop.xlane.xlu0 %1456 }
 0x39d   :  { %4556 = vpow2.f32 %v1510_v37  ;;  %v1497_v39 = vsub.f32 %v497_v12, %v1457_v38  ;;  %v1473_v12 = vsel %vm1445_vm3, %v5051_v53, -inf }
 0x39f   :  { %v1516_v42 = vmul.f32 1.442695, %v1497_v39 }
 0x3a0   :  { %v1460_v40 = vpop.xlane.xlu0 %1459 }
 0x3a1   :  { %v1498_v41 = vsub.f32 %v576_v16, %v1460_v40 }
 0x3a3   :  { %v1518_v43 = vmul.f32 1.442695, %v1498_v41 }
 0x3a4   :  { %v1466_v44 = vpop.xlane.xlu0 %1465 }
 0x3a5   :  { %4558 = vpow2.f32 %v1518_v43  ;;  %v1500_v45 = vsub.f32 %v734_v19, %v1466_v44 }
 0x3a6   :  { %4560 = vpow2.f32 %v1516_v42 }
 0x3a7   :  { %v1522_v46 = vmul.f32 1.442695, %v1500_v45 }
 0x3a8   :  { %v1550_v17 = vpop.xlane.xlu1 %1549 }
 0x3a9   :  { %4562 = vpow2.f32 %v1522_v46 }
 0x3aa   :  { %v4999_v48 = vpop.eup %4556  ;;  %4564 = vpow2.f32 %v1520_v63 }
 0x3ab   :  { %v1542_v51 = vsel %vm1445_vm3, %v4999_v48, 0.0  ;;  %4566 = vpow2.f32 %v1524_v1 }
 0x3ac   :  { %1543 = vadd.xlane.f32.xlu0 %v1542_v51 }
 0x3b2   :  { %v5003_v54 = vpop.eup %4558 }
 0x3b3   :  { %v1554_v55 = vsel %vm1445_vm3, %v5003_v54, 0.0  ;;  %v5007_v56 = vpop.eup %4560 }
 0x3b4   :  { %1555 = vadd.xlane.f32.xlu1 %v1554_v55  ;;  %v1551_v57 = vsel %vm1445_vm3, %v5007_v56, 0.0 }
 0x3b6   :  { %v5011_v58 = vpop.eup %4562 }
 0x3b7   :  { %v1560_v59 = vsel %vm1445_vm3, %v5011_v58, 0.0  ;;  %v5037_v2 = vpop.eup %4564 }
 0x3b8   :  { %1552 = vadd.xlane.f32.xlu1 %v1551_v57  ;;  %v1557_v4 = vsel %vm1445_vm3, %v5037_v2, 0.0  ;;  %v5041_v5 = vpop.eup %4566 }
 0x3b9   :  { %v1563_v8 = vsel %vm1445_vm3, %v5041_v5, 0.0 }
 0x3bc   :  { %1561 = vadd.xlane.f32.xlu1 %v1560_v59 }
 0x3c2   :  { %815 = vrot.lane.b32.xlu0 %v4853_v11, %s4731_s18 }
 0x3c6   :  { %971 = vrot.lane.b32.xlu0 %v4853_v11, %s4735_s2 }
 0x3ca   :  { %1131 = vrot.lane.b32.xlu0 %v4853_v11, %s4736_s22 }
 0x3cd   :  { %2238 = vrot.lane.b32.xlu1 %v4824_v10, %s4747_s11 }
 0x3ce   :  { %1129 = vrot.lane.b32.xlu0 %v4853_v11, %s4739_s25 }
 0x3d1   :  { %2392 = vrot.lane.b32.xlu1 %v4824_v10, %s4748_s12 }
 0x3d2   :  { %1287 = vrot.lane.b32.xlu0 %v4853_v11, %s4743_s7 }
 0x3d5   :  { %2546 = vrot.lane.b32.xlu1 %v4824_v10, %s4749_s1 }
 0x3d6   :  { %1623 = vrot.lane.b32.xlu0 %v4824_v10, %s4750_s13 }
 0x3d9   :  { %2700 = vrot.lane.b32.xlu1 %v4824_v10, %s4751_s14 }
 0x3f5   :  { %1558 = vadd.xlane.f32.xlu0 %v1557_v4 }
 0x3f9   :  { %1564 = vadd.xlane.f32.xlu0 %v1563_v8 }
 0x40f   :  { %2084 = vrot.lane.b32.xlu0 %v4824_v10, %s4752_s0  ;;  %v974_v10 = vpop.permute.xlu1 %973 }
 0x413   :  { %v1290_v23 = vpop.permute.xlu1 %1289 }
 0x417   :  { %v1931_v32 = vpop.permute.xlu1 %1930 }
 0x428   :  { %v5047_v50 = vpop.f32.mrf.mxu1 }
 0x42a   :  { %v4357_v9 = vpop.f32.mrf.mxu1 }
 0x42e   :  { %1474 = vmax.xlane.f32.xlu0 %v1473_v12  ;;  %v5141_v12 = vmul.f32 %v4995_v31, %v4961_v7  ;;  %v5155_v7 = vmul.f32 %v4997_v33, %v4924_v49 }
 0x430   :  { %v1485_v49 = vsel %vm1445_vm3, %v5155_v7, -inf }
 0x434   :  { %v1772_v13 = vpop.f32.mrf.mxu1 }
 0x435   :  { %v1544_v14 = vpop.xlane.xlu0 %1543 }
 0x436   :  { %v4367_v16 = vpop.f32.mrf.mxu1  ;;  %4568 = vrcp.f32 %v1544_v14 }
 0x437   :  { %4570 = vrcp.f32 %v1550_v17  ;;  %v1479_v17 = vsel %vm1445_vm3, %v5141_v12, -inf }
 0x439   :  { %v816_v19 = vpop.permute.xlu0 %815 }
 0x43a   :  { %4319 = vmatpush3.xpose.msk.msra.mxu0 %vm185_vm2, %v816_v19 }
 0x43b   :  { %4328 = vmatprep.subr.mxu0 %v4728_v6 }
 0x43d   :  { %4321 = vmatmul.mubr.msk.f32.vlgmr.msra.gmra.mxu0 %vm185_vm2, %v4853_v11  ;;  %v972_v30 = vpop.permute.xlu0 %971  ;;  %v1556_v35 = vpop.xlane.xlu1 %1555 }
 0x43e   :  { %4329 = vmatpush3.xpose.msk.msra.mxu0 %vm185_vm2, %v974_v10  ;;  %4330 = vmatprep.mubr.msk.f32.mxu0 %vm4729_vm1, %v4728_v6 }
 0x43f   :  { %4338 = vmatprep.subr.mxu0 %v4728_v6 }
 0x441   :  { %4331 = vmatmul.mubr.msk.f32.vlgmr.msra.gmra.mxu0 %vm185_vm2, %v972_v30  ;;  %v1132_v20 = vpop.permute.xlu0 %1131  ;;  %v1553_v36 = vpop.xlane.xlu1 %1552  ;;  %v5161_v30 = vld [vmem:[#allocation7 + $0x8] sm:$0xf] }
 0x442   :  { %4339 = vmatpush3.xpose.msk.msra.mxu0 %vm185_vm2, %v1132_v20  ;;  %4340 = vmatprep.mubr.msk.f32.mxu0 %vm4729_vm1, %v4728_v6  ;;  %4572 = vrcp.f32 %v1553_v36  ;;  %v5209_v36 = vld [vmem:[#allocation7 + $0x18] sm:$0xf] }
 0x443   :  { %4348 = vmatprep.subr.mxu0 %v4728_v6  ;;  %v4569_v25 = vpop.eup %4568  ;;  %4574 = vrcp.f32 %v1556_v35 }
 0x444   :  { %2937 = vrot.lane.b32.xlu0 %v4853_v11, %s4745_s9  ;;  %v1606_v27 = vmul.f32 %v4569_v25, %v4999_v48  ;;  %v4571_v29 = vpop.eup %4570 }
 0x445   :  { %v1130_v21 = vpop.permute.xlu0 %1129  ;;  %v1608_v34 = vmul.f32 %v4571_v29, %v4976_v22  ;;  %v1562_v37 = vpop.xlane.xlu1 %1561 }
 0x446   :  { %4341 = vmatmul.mubr.msk.f32.vlgmr.msra.gmra.mxu0 %vm185_vm2, %v1130_v21 }
 0x447   :  { %4349 = vmatpush3.xpose.msk.msra.mxu0 %vm185_vm2, %v1290_v23  ;;  %4350 = vmatprep.mubr.msk.f32.mxu0 %vm4729_vm1, %v4728_v6  ;;  %v5179_v23 = vld [vmem:[#allocation7 + $0xc] sm:$0xf] }
 0x448   :  { %4358 = vmatprep.subr.mxu0 %v4728_v6 }
 0x449   :  { %v1288_v24 = vpop.permute.xlu0 %1287  ;;  %v2239_v39 = vpop.permute.xlu1 %2238 }
 0x44a   :  { %4351 = vmatmul.mubr.msk.f32.vlgmr.msra.gmra.mxu0 %vm185_vm2, %v1288_v24 }
 0x44b   :  { %4360 = vmatprep.mubr.msk.f32.mxu0 %vm4729_vm1, %v4728_v6 }
 0x44d   :  { %v1624_v26 = vpop.permute.xlu0 %1623  ;;  %v2393_v44 = vpop.permute.xlu1 %2392 }
 0x44e   :  { %4359 = vmatpush3.msra.mxu0 %v1624_v26  ;;  %v5193_v26 = vld [vmem:[#allocation7 + $0x10] sm:$0xf] }
 0x44f   :  { %4361 = vmatmul.mubr.msk.f32.vlgmr.msra.gmra.mxu0 %vm1445_vm3, %v1606_v27  ;;  %4368 = vmatprep.subr.mxu0 %v4728_v6  ;;  %v4573_v41 = vpop.eup %4572 }
 0x450   :  { %4369 = vmatpush3.msk.msra.mxu0 %vm1780_vm4, %v5079_v28  ;;  %4370 = vmatprep.mubr.msk.f32.mxu0 %vm4729_vm1, %v4728_v6  ;;  %v1609_v42 = vmul.f32 %v4573_v41, %v5007_v56  ;;  %v4575_v43 = vpop.eup %4574  ;;  %v5108_v56 = vld [vmem:[#allocation7] sm:$0xf] }
 0x451   :  { %4378 = vmatprep.subr.mxu0 %v4728_v6  ;;  %v1610_v45 = vmul.f32 %v4575_v43, %v5003_v54  ;;  %v2547_v51 = vpop.permute.xlu1 %2546  ;;  %4374 = vmatpush3.msk.msra.mxu1 %vm1780_vm4, %v5108_v56 }
 0x452   :  { %4383 = vmatprep.subr.mxu1 %v4728_v6 }
 0x453   :  { %4371 = vmatmul.mubr.msk.f32.vlgmr.msra.gmra.mxu0 %vm185_vm2, %v1772_v13 }
 0x454   :  { %4379 = vmatpush3.msra.mxu0 %v1931_v32  ;;  %4380 = vmatprep.mubr.msk.f32.mxu0 %vm4729_vm1, %v4728_v6  ;;  %v5201_v32 = vld [vmem:[#allocation7 + $0x14] sm:$0xf] }
 0x455   :  { %4388 = vmatprep.subr.mxu0 %v4728_v6  ;;  %v2701_v59 = vpop.permute.xlu1 %2700 }
 0x457   :  { %4381 = vmatmul.mubr.msk.f32.vlgmr.msra.gmra.mxu0 %vm1445_vm3, %v1608_v34 }
 0x458   :  { %4390 = vmatprep.mubr.msk.f32.mxu0 %vm4729_vm1, %v4728_v6 }
 0x47e   :  { %v1559_v38 = vpop.xlane.xlu0 %1558 }
 0x47f   :  { %4576 = vrcp.f32 %v1559_v38 }
 0x480   :  { %4578 = vrcp.f32 %v1562_v37 }
 0x482   :  { %v1565_v40 = vpop.xlane.xlu0 %1564 }
 0x483   :  { %4580 = vrcp.f32 %v1565_v40 }
 0x486   :  { %v2085_v22 = vpop.permute.xlu0 %2084 }
 0x487   :  { %4389 = vmatpush3.msra.mxu0 %v2085_v22 }
 0x488   :  { %4391 = vmatmul.mubr.msk.f32.vlgmr.msra.gmra.mxu0 %vm1445_vm3, %v1609_v42  ;;  %4398 = vmatprep.subr.mxu0 %v4728_v6 }
 0x489   :  { %4399 = vmatpush3.msra.mxu0 %v2239_v39  ;;  %4400 = vmatprep.mubr.msk.f32.mxu0 %vm4729_vm1, %v4728_v6  ;;  %v5217_v39 = vld [vmem:[#allocation7 + $0x1c] sm:$0xf] }
 0x48a   :  { %4408 = vmatprep.subr.mxu0 %v4728_v6 }
 0x48c   :  { %v4577_v46 = vpop.eup %4576  ;;  %4401 = vmatmul.mubr.msk.f32.vlgmr.msra.gmra.mxu0 %vm1445_vm3, %v1610_v45 }
 0x48d   :  { %4409 = vmatpush3.msra.mxu0 %v2393_v44  ;;  %4410 = vmatprep.mubr.msk.f32.mxu0 %vm4729_vm1, %v4728_v6  ;;  %v1611_v48 = vmul.f32 %v4577_v46, %v5037_v2  ;;  %v4579_v55 = vpop.eup %4578 }
 0x48e   :  { %4418 = vmatprep.subr.mxu0 %v4728_v6  ;;  %v1612_v54 = vmul.f32 %v4579_v55, %v5011_v58 }
 0x490   :  { %4411 = vmatmul.mubr.msk.f32.vlgmr.msra.gmra.mxu0 %vm1445_vm3, %v1611_v48  ;;  %v4581_v57 = vpop.eup %4580 }
 0x491   :  { %4419 = vmatpush3.msra.mxu0 %v2547_v51  ;;  %4420 = vmatprep.mubr.msk.f32.mxu0 %vm4729_vm1, %v4728_v6  ;;  %v1613_v60 = vmul.f32 %v4581_v57, %v5041_v5 }
 0x492   :  { %4428 = vmatprep.subr.mxu0 %v4728_v6 }
 0x494   :  { %4421 = vmatmul.mubr.msk.f32.vlgmr.msra.gmra.mxu0 %vm1445_vm3, %v1612_v54 }
 0x495   :  { %4429 = vmatpush3.msra.mxu0 %v2701_v59  ;;  %4430 = vmatprep.mubr.msk.f32.mxu0 %vm4729_vm1, %v4728_v6 }
 0x496   :  { %4438 = vmatprep.subr.mxu0 %v4728_v6 }
 0x498   :  { %4431 = vmatmul.mubr.msk.f32.vlgmr.msra.gmra.mxu0 %vm1445_vm3, %v1613_v60 }
 0x499   :  { %4440 = vmatprep.mubr.msk.f32.mxu0 %vm4729_vm1, %v4728_v6 }
 0x4b7   :  { %v1475_v58 = vpop.xlane.xlu0 %1474 }
 0x4b8   :  { %v1503_v61 = vsub.f32 %v5051_v53, %v1475_v58 }
 0x4ba   :  { %v1528_v62 = vmul.f32 1.442695, %v1503_v61 }
 0x4bb   :  { %v2938_v43 = vpop.permute.xlu0 %2937 }
 0x4bc   :  { %4582 = vpow2.f32 %v1528_v62 }
 0x4c9   :  { %v5127_v63 = vpop.eup %4582 }
 0x4ca   :  { %v1569_v0 = vsel %vm1445_vm3, %v5127_v63, 0.0 }
 0x4cb   :  { %1570 = vadd.xlane.f32.xlu1 %v1569_v0 }
 0x4fd   :  { %v887_v1 = vpop.f32.mrf.mxu0 }
 0x4fe   :  { %v5132_v2 = vmul.f32 %v887_v1, %v4957_v3 }
 0x4ff   :  { %v4322_v4 = vpop.f32.mrf.mxu0 }
 0x500   :  { %v1470_v5 = vsel %vm1445_vm3, %v5132_v2, -inf }
 0x501   :  { %v1045_v8 = vpop.f32.mrf.mxu0  ;;  %1471 = vmax.xlane.f32.xlu1 %v1470_v5 }
 0x502   :  { %v5137_v53 = vmul.f32 %v1045_v8, %v4921_v47 }
 0x503   :  { %v4332_v9 = vpop.f32.mrf.mxu0 }
 0x504   :  { %v1476_v13 = vsel %vm1445_vm3, %v5137_v53, -inf }
 0x505   :  { %1477 = vmax.xlane.f32.xlu1 %v1476_v13 }
 0x506   :  { %v1203_v3 = vpop.f32.mrf.mxu0 }
 0x507   :  { %v5146_v14 = vmul.f32 %v1203_v3, %v4965_v15 }
 0x508   :  { %v4342_v16 = vpop.f32.mrf.mxu0 }
 0x509   :  { %1480 = vmax.xlane.f32.xlu1 %v1479_v17  ;;  %v1482_v10 = vsel %vm1445_vm3, %v5146_v14, -inf }
 0x50a   :  { %v1361_v47 = vpop.f32.mrf.mxu0 }
 0x50b   :  { %v5151_v19 = vmul.f32 %v1361_v47, %v4970_v18  ;;  %v5165_v18 = vmul.f32 %v5047_v50, %v4930_v52 }
 0x50c   :  { %v4352_v31 = vpop.f32.mrf.mxu0 }
 0x50d   :  { %1483 = vmax.xlane.f32.xlu1 %v1482_v10  ;;  %v1488_v15 = vsel %vm1445_vm3, %v5151_v19, -inf  ;;  %v1491_v52 = vsel %vm1445_vm3, %v5165_v18, -inf }
 0x50e   :  { %1489 = vmax.xlane.f32.xlu0 %v1488_v15 }
 0x50f   :  { %v1695_v20 = vpop.f32.mrf.mxu0 }
 0x510   :  { %4376 = vmatmul.mubr.msk.f32.vlgmr.msra.gmra.mxu1 %vm185_vm2, %v1695_v20 }
 0x511   :  { %v4362_v33 = vpop.f32.mrf.mxu0  ;;  %1486 = vmax.xlane.f32.xlu1 %v1485_v49  ;;  %4384 = vmatpush3.msk.msra.mxu1 %vm1780_vm4, %v5161_v30 }
 0x512   :  { %4385 = vmatprep.mubr.msk.f32.mxu1 %vm4729_vm1, %v4728_v6  ;;  %4393 = vmatprep.subr.mxu1 %v4728_v6 }
 0x513   :  { %v5175_v21 = vpop.f32.mrf.mxu0 }
 0x515   :  { %v4372_v50 = vpop.f32.mrf.mxu0  ;;  %1492 = vmax.xlane.f32.xlu1 %v1491_v52 }
 0x517   :  { %v2002_v24 = vpop.f32.mrf.mxu0 }
 0x518   :  { %4386 = vmatmul.mubr.msk.f32.vlgmr.msra.gmra.mxu1 %vm185_vm2, %v2002_v24 }
 0x519   :  { %v4382_v25 = vpop.f32.mrf.mxu0  ;;  %4394 = vmatpush3.msk.msra.mxu1 %vm1780_vm4, %v5179_v23  ;;  %4395 = vmatprep.mubr.msk.f32.mxu1 %vm4729_vm1, %v4728_v6 }
 0x51a   :  { %4403 = vmatprep.subr.mxu1 %v4728_v6 }
 0x524   :  { %2861 = vrot.lane.b32.xlu0 %v4853_v11, %s4750_s13 }
 0x528   :  { %3459 = vrot.lane.b32.xlu0 %v4853_v11, %s4747_s11 }
 0x52c   :  { %3759 = vrot.lane.b32.xlu0 %v4853_v11, %s4749_s1 }
 0x548   :  { %v2156_v27 = vpop.f32.mrf.mxu0 }
 0x549   :  { %4396 = vmatmul.mubr.msk.f32.vlgmr.msra.gmra.mxu1 %vm185_vm2, %v2156_v27 }
 0x54a   :  { %v4392_v29 = vpop.f32.mrf.mxu0  ;;  %4404 = vmatpush3.msk.msra.mxu1 %vm1780_vm4, %v5193_v26  ;;  %4405 = vmatprep.mubr.msk.f32.mxu1 %vm4729_vm1, %v4728_v6 }
 0x54b   :  { %4413 = vmatprep.subr.mxu1 %v4728_v6 }
 0x54c   :  { %v2310_v34 = vpop.f32.mrf.mxu0 }
 0x54d   :  { %4406 = vmatmul.mubr.msk.f32.vlgmr.msra.gmra.mxu1 %vm185_vm2, %v2310_v34 }
 0x54e   :  { %v4402_v35 = vpop.f32.mrf.mxu0  ;;  %4414 = vmatpush3.msk.msra.mxu1 %vm1780_vm4, %v5201_v32  ;;  %4415 = vmatprep.mubr.msk.f32.mxu1 %vm4729_vm1, %v4728_v6 }
 0x54f   :  { %4423 = vmatprep.subr.mxu1 %v4728_v6 }
 0x550   :  { %v2464_v37 = vpop.f32.mrf.mxu0 }
 0x551   :  { %4416 = vmatmul.mubr.msk.f32.vlgmr.msra.gmra.mxu1 %vm185_vm2, %v2464_v37 }
 0x552   :  { %v4412_v38 = vpop.f32.mrf.mxu0  ;;  %4424 = vmatpush3.msk.msra.mxu1 %vm1780_vm4, %v5209_v36  ;;  %4425 = vmatprep.mubr.msk.f32.mxu1 %vm4729_vm1, %v4728_v6 }
 0x553   :  { %4433 = vmatprep.subr.mxu1 %v4728_v6 }
 0x554   :  { %v2618_v40 = vpop.f32.mrf.mxu0  ;;  %v1571_v41 = vpop.xlane.xlu1 %1570 }
 0x555   :  { %4584 = vrcp.f32 %v1571_v41  ;;  %4426 = vmatmul.mubr.msk.f32.vlgmr.msra.gmra.mxu1 %vm185_vm2, %v2618_v40 }
 0x556   :  { %v4422_v22 = vpop.f32.mrf.mxu0  ;;  %4434 = vmatpush3.msk.msra.mxu1 %vm1780_vm4, %v5217_v39  ;;  %4435 = vmatprep.mubr.msk.f32.mxu1 %vm4729_vm1, %v4728_v6 }
 0x557   :  { %4443 = vmatprep.subr.mxu1 %v4728_v6 }
 0x558   :  { %v2772_v42 = vpop.f32.mrf.mxu0 }
 0x559   :  { %4436 = vmatmul.mubr.msk.f32.vlgmr.msra.gmra.mxu1 %vm185_vm2, %v2772_v42 }
 0x55a   :  { %4444 = vmatpush3.msra.mxu1 %v2938_v43  ;;  %v4432_v44 = vpop.f32.mrf.mxu0  ;;  %4445 = vmatprep.mubr.msk.f32.mxu1 %vm4729_vm1, %v4728_v6 }
 0x55b   :  { %4453 = vmatprep.subr.mxu1 %v4728_v6 }
 0x562   :  { %v4585_v45 = vpop.eup %4584 }
 0x563   :  { %v1615_v46 = vmul.f32 %v4585_v45, %v5127_v63 }
 0x565   :  { %4446 = vmatmul.mubr.msk.f32.vlgmr.msra.gmra.mxu1 %vm1445_vm3, %v1615_v46 }
 0x566   :  { %4454 = vmatpush3.msk.msra.mxu1 %vm1780_vm4, %v5108_v56  ;;  %4455 = vmatprep.mubr.msk.f32.mxu1 %vm4729_vm1, %v4728_v6 }
 0x567   :  { %4463 = vmatprep.subr.mxu1 %v4728_v6 }
 0x58a   :  { %v1472_v48 = vpop.xlane.xlu1 %1471 }
 0x58b   :  { %v1502_v51 = vsub.f32 %v5132_v2, %v1472_v48  ;;  %v5284_v48 = vld [vmem:[%s5373_s4] ss:$0 sm:$0xff]  ;;  %s4753_s4 = smov [#allocation10]  }
 0x58c   :  { %s4067_s3 = sshll.u32 %s4753_s4, 4  ;;  %s4068_s3 = int_to_ptr.vmem [resolvable:$true] %s4067_s3 }
 0x58d   :  { %v1526_v55 = vmul.f32 1.442695, %v1502_v51  ;;  %s4694_s5 = scalar_lea.vmem %s4068_s3, 256  ;;  %p4699_p7 = scmp.lt.s32.totalorder %s4068_s3, %s4068_s3 }
 0x58e   :  { %v1478_v54 = vpop.xlane.xlu1 %1477  ;;  %p4695_p6 = scmp.ne.s32.totalorder %s4068_s3, %s4694_s5  ;;  %p4700_p8 = scmp.lt.s32.totalorder %s4694_s5, %s4694_s5 }
 0x58f   :  { %4586 = vpow2.f32 %v1526_v55  ;;  %v1504_v57 = vsub.f32 %v5137_v53, %v1478_v54 }
 0x590   :  { %p4701_p9 = por %p4700_p8, %p4699_p7 }
 0x591   :  { %v1530_v59 = vmul.f32 1.442695, %v1504_v57 }
 0x592   :  { %v1481_v0 = vpop.xlane.xlu1 %1480  ;;  %p4702_p10 = pnand %p4701_p9, %p4695_p6 }
 0x593   :  { %4588 = vpow2.f32 %v1530_v59  ;;  %v1505_v4 = vsub.f32 %v5141_v12, %v1481_v0 }
 0x595   :  { %v1532_v53 = vmul.f32 1.442695, %v1505_v4 }
 0x596   :  { %v1484_v1 = vpop.xlane.xlu1 %1483 }
 0x597   :  { %v1490_v60 = vpop.xlane.xlu0 %1489  ;;  %v1506_v2 = vsub.f32 %v5146_v14, %v1484_v1 }
 0x598   :  { %v1508_v9 = vsub.f32 %v5151_v19, %v1490_v60 }
 0x599   :  { %v1534_v5 = vmul.f32 1.442695, %v1506_v2 }
 0x59a   :  { %v1487_v8 = vpop.xlane.xlu1 %1486  ;;  %v1538_v3 = vmul.f32 1.442695, %v1508_v9 }
 0x59b   :  { %v2862_v58 = vpop.permute.xlu0 %2861  ;;  %4590 = vpow2.f32 %v1534_v5  ;;  %v1507_v16 = vsub.f32 %v5155_v7, %v1487_v8 }
 0x59c   :  { %v5238_v61 = vpop.eup %4586  ;;  %4439 = vmatpush3.msra.mxu0 %v2862_v58  ;;  %4592 = vpow2.f32 %v1532_v53 }
 0x59d   :  { %v1566_v56 = vsel %vm1445_vm3, %v5238_v61, 0.0  ;;  %4448 = vmatprep.subr.mxu0 %v4728_v6  ;;  %4594 = vpow2.f32 %v1538_v3  ;;  %v1536_v31 = vmul.f32 1.442695, %v1507_v16 }
 0x59e   :  { %1567 = vadd.xlane.f32.xlu1 %v1566_v56  ;;  %v1493_v47 = vpop.xlane.xlu1 %1492 }
 0x59f   :  { %v1509_v10 = vsub.f32 %v5165_v18, %v1493_v47  ;;  %4596 = vpow2.f32 %v1536_v31  ;;  %v3460_v3 = vpop.permute.xlu0 %3459 }
 0x5a0   :  { %v5243_v62 = vpop.eup %4588 }
 0x5a1   :  { %v1572_v63 = vsel %vm1445_vm3, %v5243_v62, 0.0  ;;  %v1540_v12 = vmul.f32 1.442695, %v1509_v10 }
 0x5a2   :  { %1573 = vadd.xlane.f32.xlu1 %v1572_v63 }
 0x5a3   :  { %4598 = vpow2.f32 %v1540_v12  ;;  %v3760_v10 = vpop.permute.xlu0 %3759 }
 0x5a8   :  { %v5258_v20 = vpop.eup %4590 }
 0x5a9   :  { %v1578_v19 = vsel %vm1445_vm3, %v5258_v20, 0.0  ;;  %v5262_v49 = vpop.eup %4592 }
 0x5aa   :  { %v1575_v7 = vsel %vm1445_vm3, %v5262_v49, 0.0  ;;  %v5266_v33 = vpop.eup %4594 }
 0x5ab   :  { %v1584_v18 = vsel %vm1445_vm3, %v5266_v33, 0.0 }
 0x5ac   :  { %v5270_v52 = vpop.eup %4596 }
 0x5ad   :  { %v1581_v50 = vsel %vm1445_vm3, %v5270_v52, 0.0 }
 0x5b0   :  { %v5274_v24 = vpop.eup %4598 }
 0x5b1   :  { %v1587_v25 = vsel %vm1445_vm3, %v5274_v24, 0.0 }
 0x5b3   :  { %3159 = vrot.lane.b32.xlu1 %v4853_v11, %s4746_s10 }
 0x5b7   :  { %3309 = vrot.lane.b32.xlu1 %v4853_v11, %s4752_s0 }
 0x5bb   :  { %3609 = vrot.lane.b32.xlu1 %v4853_v11, %s4748_s12 }
 0x5d0   :  { %v1926_v13 = vpop.f32.mrf.mxu1 }
 0x5d1   :  { %v1927_v35 = vadd.f32 %v1926_v13, %v5175_v21 }
 0x5d2   :  { %v4377_v17 = vpop.f32.mrf.mxu1 }
 0x5d8   :  { %v2079_v14 = vpop.f32.mrf.mxu1 }
 0x5d9   :  { %v2083_v38 = vadd.f32 %v2079_v14, %v1927_v35 }
 0x5da   :  { %v4387_v15 = vpop.f32.mrf.mxu1 }
 0x5df   :  { %1579 = vadd.xlane.f32.xlu1 %v1578_v19 }
 0x5e3   :  { %1576 = vadd.xlane.f32.xlu1 %v1575_v7 }
 0x5e7   :  { %1585 = vadd.xlane.f32.xlu1 %v1584_v18 }
 0x5eb   :  { %1582 = vadd.xlane.f32.xlu1 %v1581_v50 }
 0x5ef   :  { %1588 = vadd.xlane.f32.xlu1 %v1587_v25 }
 0x600   :  { %3909 = vrot.lane.b32.xlu1 %v4853_v11, %s4751_s14 }
 0x609   :  { %v2233_v27 = vpop.f32.mrf.mxu1 }
 0x60a   :  { %v2237_v41 = vadd.f32 %v2233_v27, %v2083_v38 }
 0x60b   :  { %v4397_v29 = vpop.f32.mrf.mxu1 }
 0x60d   :  { %v2387_v34 = vpop.f32.mrf.mxu1 }
 0x60e   :  { %v2391_v42 = vadd.f32 %v2387_v34, %v2237_v41 }
 0x60f   :  { %v4407_v37 = vpop.f32.mrf.mxu1 }
 0x611   :  { %v2541_v40 = vpop.f32.mrf.mxu1 }
 0x612   :  { %v2545_v44 = vadd.f32 %v2541_v40, %v2391_v42 }
 0x613   :  { %v4417_v22 = vpop.f32.mrf.mxu1 }
 0x615   :  { %v2695_v43 = vpop.f32.mrf.mxu1 }
 0x616   :  { %v2699_v46 = vadd.f32 %v2695_v43, %v2545_v44 }
 0x617   :  { %v4427_v45 = vpop.f32.mrf.mxu1 }
 0x619   :  { %v2849_v11 = vpop.f32.mrf.mxu1 }
 0x61a   :  { %v2853_v51 = vadd.f32 %v2849_v11, %v2699_v46 }
 0x61b   :  { %v4437_v55 = vpop.f32.mrf.mxu1 }
 0x61c   :  { %v2860_v21 = vadd.f32 %v5284_v48, %v2853_v51 }
 0x61e   :  { %4060 = vst.msk [vmem:[#allocation10] sm:$0xff] %vm92_vm0, %v2860_v21 }
 0x625   :  { %v3009_v54 = vpop.f32.mrf.mxu1 }
 0x627   :  { %v1568_v57 = vpop.xlane.xlu1 %1567  ;;  %v4447_v59 = vpop.f32.mrf.mxu1 }
 0x628   :  { %4600 = vrcp.f32 %v1568_v57 }
 0x62b   :  { %v1574_v60 = vpop.xlane.xlu1 %1573 }
 0x62c   :  { %4602 = vrcp.f32 %v1574_v60 }
 0x62f   :  { %v3160_v63 = vpop.permute.xlu1 %3159 }
 0x633   :  { %v3310_v1 = vpop.permute.xlu1 %3309 }
 0x635   :  { %v4601_v58 = vpop.eup %4600 }
 0x636   :  { %v1614_v56 = vmul.f32 %v4601_v58, %v5238_v61 }
 0x638   :  { %4441 = vmatmul.mubr.msk.f32.vlgmr.msra.gmra.mxu0 %vm1445_vm3, %v1614_v56 }
 0x639   :  { %4449 = vmatpush3.msk.msra.mxu0 %vm1780_vm4, %v5079_v28  ;;  %4450 = vmatprep.mubr.msk.f32.mxu0 %vm4729_vm1, %v4728_v6  ;;  %v4603_v0 = vpop.eup %4602  ;;  %v3610_v28 = vpop.permute.xlu1 %3609 }
 0x63a   :  { %4458 = vmatprep.subr.mxu0 %v4728_v6  ;;  %v1616_v61 = vmul.f32 %v4603_v0, %v5243_v62 }
 0x63c   :  { %4451 = vmatmul.mubr.msk.f32.vlgmr.msra.gmra.mxu0 %vm185_vm2, %v3009_v54 }
 0x63d   :  { %4459 = vmatpush3.msra.mxu0 %v3160_v63  ;;  %4460 = vmatprep.mubr.msk.f32.mxu0 %vm4729_vm1, %v4728_v6 }
 0x63e   :  { %4468 = vmatprep.subr.mxu0 %v4728_v6 }
 0x640   :  { %4461 = vmatmul.mubr.msk.f32.vlgmr.msra.gmra.mxu0 %vm1445_vm3, %v1616_v61 }
 0x641   :  { %4469 = vmatpush3.msra.mxu0 %v3310_v1  ;;  %4470 = vmatprep.mubr.msk.f32.mxu0 %vm4729_vm1, %v4728_v6 }
 0x642   :  { %4478 = vmatprep.subr.mxu0 %v4728_v6 }
 0x668   :  { %v1580_v2 = vpop.xlane.xlu1 %1579 }
 0x66c   :  { %v1577_v4 = vpop.xlane.xlu1 %1576 }
 0x66d   :  { %4604 = vrcp.f32 %v1577_v4 }
 0x66e   :  { %4606 = vrcp.f32 %v1580_v2 }
 0x670   :  { %v1586_v5 = vpop.xlane.xlu1 %1585 }
 0x674   :  { %v1583_v8 = vpop.xlane.xlu1 %1582 }
 0x675   :  { %4608 = vrcp.f32 %v1583_v8 }
 0x676   :  { %4610 = vrcp.f32 %v1586_v5 }
 0x678   :  { %v1589_v53 = vpop.xlane.xlu1 %1588 }
 0x679   :  { %4612 = vrcp.f32 %v1589_v53 }
 0x67a   :  { %v4605_v62 = vpop.eup %4604 }
 0x67b   :  { %v1617_v9 = vmul.f32 %v4605_v62, %v5262_v49  ;;  %v4607_v13 = vpop.eup %4606 }
 0x67c   :  { %v1618_v16 = vmul.f32 %v4607_v13, %v5258_v20  ;;  %v3910_v15 = vpop.permute.xlu1 %3909 }
 0x67d   :  { %4471 = vmatmul.mubr.msk.f32.vlgmr.msra.gmra.mxu0 %vm1445_vm3, %v1617_v9 }
 0x67e   :  { %4479 = vmatpush3.msra.mxu0 %v3460_v3  ;;  %4480 = vmatprep.mubr.msk.f32.mxu0 %vm4729_vm1, %v4728_v6 }
 0x67f   :  { %4488 = vmatprep.subr.mxu0 %v4728_v6 }
 0x681   :  { %4481 = vmatmul.mubr.msk.f32.vlgmr.msra.gmra.mxu0 %vm1445_vm3, %v1618_v16 }
 0x682   :  { %v4609_v17 = vpop.eup %4608  ;;  %4489 = vmatpush3.msra.mxu0 %v3610_v28  ;;  %4490 = vmatprep.mubr.msk.f32.mxu0 %vm4729_vm1, %v4728_v6 }
 0x683   :  { %4498 = vmatprep.subr.mxu0 %v4728_v6  ;;  %v1619_v47 = vmul.f32 %v4609_v17, %v5270_v52  ;;  %v4611_v31 = vpop.eup %4610 }
 0x684   :  { %v1620_v14 = vmul.f32 %v4611_v31, %v5266_v33 }
 0x685   :  { %4491 = vmatmul.mubr.msk.f32.vlgmr.msra.gmra.mxu0 %vm1445_vm3, %v1619_v47 }
 0x686   :  { %4499 = vmatpush3.msra.mxu0 %v3760_v10  ;;  %4500 = vmatprep.mubr.msk.f32.mxu0 %vm4729_vm1, %v4728_v6  ;;  %v4613_v12 = vpop.eup %4612 }
 0x687   :  { %4508 = vmatprep.subr.mxu0 %v4728_v6  ;;  %v1621_v20 = vmul.f32 %v4613_v12, %v5274_v24 }
 0x689   :  { %4501 = vmatmul.mubr.msk.f32.vlgmr.msra.gmra.mxu0 %vm1445_vm3, %v1620_v14 }
 0x68a   :  { %4509 = vmatpush3.msra.mxu0 %v3910_v15  ;;  %4510 = vmatprep.mubr.msk.f32.mxu0 %vm4729_vm1, %v4728_v6 }
 0x68d   :  { %4511 = vmatmul.mubr.msk.f32.vlgmr.msra.gmra.mxu0 %vm1445_vm3, %v1621_v20 }
 0x6f8   :  { %v2933_v19 = vpop.f32.mrf.mxu0 }
 0x6f9   :  { %4456 = vmatmul.mubr.msk.f32.vlgmr.msra.gmra.mxu1 %vm185_vm2, %v2933_v19 }
 0x6fa   :  { %v4442_v49 = vpop.f32.mrf.mxu0  ;;  %4464 = vmatpush3.msk.msra.mxu1 %vm1780_vm4, %v5161_v30  ;;  %4465 = vmatprep.mubr.msk.f32.mxu1 %vm4729_vm1, %v4728_v6 }
 0x6fb   :  { %4473 = vmatprep.subr.mxu1 %v4728_v6 }
 0x6fc   :  { %v3082_v7 = vpop.f32.mrf.mxu0 }
 0x6fe   :  { %v4452_v33 = vpop.f32.mrf.mxu0 }
 0x700   :  { %v3231_v18 = vpop.f32.mrf.mxu0 }
 0x701   :  { %4466 = vmatmul.mubr.msk.f32.vlgmr.msra.gmra.mxu1 %vm185_vm2, %v3231_v18 }
 0x702   :  { %v4462_v52 = vpop.f32.mrf.mxu0  ;;  %4474 = vmatpush3.msk.msra.mxu1 %vm1780_vm4, %v5179_v23  ;;  %4475 = vmatprep.mubr.msk.f32.mxu1 %vm4729_vm1, %v4728_v6 }
 0x703   :  { %4483 = vmatprep.subr.mxu1 %v4728_v6 }
 0x73d   :  { %v3381_v30 = vpop.f32.mrf.mxu0 }
 0x73e   :  { %4476 = vmatmul.mubr.msk.f32.vlgmr.msra.gmra.mxu1 %vm185_vm2, %v3381_v30 }
 0x73f   :  { %v4472_v50 = vpop.f32.mrf.mxu0  ;;  %4484 = vmatpush3.msk.msra.mxu1 %vm1780_vm4, %v5193_v26  ;;  %4485 = vmatprep.mubr.msk.f32.mxu1 %vm4729_vm1, %v4728_v6 }
 0x740   :  { %4493 = vmatprep.subr.mxu1 %v4728_v6 }
 0x741   :  { %v3531_v24 = vpop.f32.mrf.mxu0 }
 0x742   :  { %4486 = vmatmul.mubr.msk.f32.vlgmr.msra.gmra.mxu1 %vm185_vm2, %v3531_v24 }
 0x743   :  { %v4482_v23 = vpop.f32.mrf.mxu0  ;;  %4494 = vmatpush3.msk.msra.mxu1 %vm1780_vm4, %v5201_v32  ;;  %4495 = vmatprep.mubr.msk.f32.mxu1 %vm4729_vm1, %v4728_v6 }
 0x744   :  { %4503 = vmatprep.subr.mxu1 %v4728_v6 }
 0x745   :  { %v3681_v25 = vpop.f32.mrf.mxu0 }
 0x746   :  { %4496 = vmatmul.mubr.msk.f32.vlgmr.msra.gmra.mxu1 %vm185_vm2, %v3681_v25 }
 0x747   :  { %v4492_v26 = vpop.f32.mrf.mxu0  ;;  %4504 = vmatpush3.msk.msra.mxu1 %vm1780_vm4, %v5209_v36  ;;  %4505 = vmatprep.mubr.msk.f32.mxu1 %vm4729_vm1, %v4728_v6 }
 0x748   :  { %4513 = vmatprep.subr.mxu1 %v4728_v6 }
 0x749   :  { %v3831_v27 = vpop.f32.mrf.mxu0 }
 0x74a   :  { %4506 = vmatmul.mubr.msk.f32.vlgmr.msra.gmra.mxu1 %vm185_vm2, %v3831_v27 }
 0x74b   :  { %v4502_v32 = vpop.f32.mrf.mxu0  ;;  %4514 = vmatpush3.msk.msra.mxu1 %vm1780_vm4, %v5217_v39  ;;  %4515 = vmatprep.mubr.msk.f32.mxu1 %vm4729_vm1, %v4728_v6 }
 0x74d   :  { %v3981_v29 = vpop.f32.mrf.mxu0 }
 0x74e   :  { %4516 = vmatmul.mubr.msk.f32.vlgmr.msra.gmra.mxu1 %vm185_vm2, %v3981_v29 }
 0x74f   :  { %v4512_v34 = vpop.f32.mrf.mxu0 }
 0x7b9   :  { %v3155_v36 = vpop.f32.mrf.mxu1 }
 0x7ba   :  { %v3156_v37 = vadd.f32 %v3155_v36, %v3082_v7 }
 0x7bb   :  { %v4457_v35 = vpop.f32.mrf.mxu1 }
 0x7c1   :  { %v3304_v38 = vpop.f32.mrf.mxu1 }
 0x7c2   :  { %v3308_v40 = vadd.f32 %v3304_v38, %v3156_v37 }
 0x7c3   :  { %v4467_v41 = vpop.f32.mrf.mxu1 }
 0x7fe   :  { %v3454_v22 = vpop.f32.mrf.mxu1 }
 0x7ff   :  { %v3458_v46 = vadd.f32 %v3454_v22, %v3308_v40 }
 0x800   :  { %v4477_v42 = vpop.f32.mrf.mxu1 }
 0x802   :  { %v3604_v43 = vpop.f32.mrf.mxu1 }
 0x803   :  { %v3608_v11 = vadd.f32 %v3604_v43, %v3458_v46 }
 0x804   :  { %v4487_v44 = vpop.f32.mrf.mxu1 }
 0x806   :  { %v3754_v45 = vpop.f32.mrf.mxu1 }
 0x807   :  { %v3758_v6 = vadd.f32 %v3754_v45, %v3608_v11 }
 0x808   :  { %v4497_v39 = vpop.f32.mrf.mxu1 }
 0x80a   :  { %v3904_v51 = vpop.f32.mrf.mxu1 }
 0x80b   :  { %v3908_v21 = vadd.f32 %v3904_v51, %v3758_v6 }
 0x80c   :  { %v4507_v55 = vpop.f32.mrf.mxu1 }
 0x80e   :  { %v4054_v54 = vpop.f32.mrf.mxu1 }
 0x80f   :  { %v4058_v57 = vadd.f32 %v4054_v54, %v3908_v21 }
 0x810   :  { %v4517_v59 = vpop.f32.mrf.mxu1 }
 0x811   :  { %v4059_v60 = vadd.f32 %v5284_v48, %v4058_v57 }
 0x813   :  { %4061 = vst.msk [vmem:[#allocation10 + $0x8] sm:$0xff] %vm92_vm0, %v4059_v60 }
 0x814   :  { %4705 = shalt.err (!%p4702_p10)
}
 0x815   :  { %4073 = dma.vmem_to_hbm [thread:$0]  %s4068_s3, 256, %s5375_s6, [#allocation4], %s4724_s26, %s4724_s26, %s4725_s27  }
 0x816   :  { %4720 = dma.done.wait [#allocation4], 256  }
 0x817   :  { %4721 = vsyncadd [#allocation4], 4294967040 }
 0x818   :  { %4077 = vsyncpa [#allocation3], 1 }
 0x819   :  { %4078 = vsyncpa [#allocation6], 1 }
 0x81a   :  { %4079 = vsyncpa [#allocation9], 1 }
 0x81b   :  { %4080 = vsyncpa [#allocation4], 1 }

</bundles_post_ra>
